<compile_context>
chip_gen: v7x
topology: tpu7x:2x2x1
jax: 0.10.0
libtpu: 0.0.40
codegen_flags: <defaults>
</compile_context>

<pallas_src>
import jax
import jax.numpy as jnp
from jax.experimental import pallas as pl
from jax.experimental.pallas import tpu as pltpu

BN_EPS = 1e-5
_MIB = 1024 * 1024


def _round_up(x, m):
    return (x + m - 1) // m * m


def _vmem_config():
    """Per-generation VMEM sizing -> (vmem_limit_bytes, pipeline_buffer_budget)."""
    vmem_bytes = None
    try:
        info = pltpu.get_tpu_info()
        for name in ("vmem_capacity_bytes", "vmem_size_bytes", "vmem_bytes"):
            vmem_bytes = getattr(info, name, None)
            if vmem_bytes:
                break
    except Exception:
        vmem_bytes = None
    if not vmem_bytes:
        vmem_bytes = 64 * _MIB            # conservative: assume a v7x-sized part
    if vmem_bytes >= 96 * _MIB:           # v5e / v6e: 128 MiB physical VMEM
        return 96 * _MIB, 64 * _MIB
    return 48 * _MIB, 26 * _MIB           # v7x: 64 MiB physical per TensorCore


def _const_block_spec(block_shape, index_map):
    """BlockSpec for blocks whose index_map is constant across the grid: a second
    pipeline buffer is pure VMEM waste, so request single buffering when available."""
    if hasattr(pl, "Buffered"):
        try:
            return pl.BlockSpec(block_shape, index_map, pipeline_mode=pl.Buffered(1))
        except TypeError:
            pass
    return pl.BlockSpec(block_shape, index_map)


def _pick_row_tile(n, hw, c, x_itemsize, o_pad, pipeline_budget):
    """Largest ROI row tile (multiple of 8) whose double-buffered pipeline footprint
    fits the budget, with >= 2 grid steps (preferably an even count) whenever there
    is enough work to split across v7x's two TensorCores."""
    # Padded VMEM footprint of one ROI row of x: the (HW, C) slab rounds up to
    # (sublane, lane) = (8, 128) granularity.
    x_row = _round_up(hw, 8) * _round_up(c, 128) * x_itemsize
    y_row = o_pad * 4                                           # f32 pre-BN output row
    fixed = (_round_up(c, 8) * o_pad * 4                        # weight (single-buffered)
             + 2 * 8 * o_pad * 4)                               # partial-sum block, x2 buffers
    avail = max(pipeline_budget - fixed, 16 * (x_row + y_row))
    fit = max(8, (avail // (2 * (x_row + y_row))) // 8 * 8)     # x & y double-buffered
    cap = _round_up(n, 8)
    if n > 8:                                                   # >= 2 grid steps (megacore)
        cap = min(cap, _round_up(pl.cdiv(n, 2), 8))
    best = min(fit, cap)
    # Prefer an even number of grid steps so both v7x TensorCores get equal work.
    for nt in range(best, 7, -8):
        if pl.cdiv(n, nt) % 2 == 0:
            return nt
    return best


def _make_pool_linear_kernel(inv_hw, mxu_dtype):
    def kernel(x_ref, w_ref, y_ref, ps_ref):
        # x_ref:  (nt, HW, C)   lane-dense activations (C on the 128-lane axis)
        # w_ref:  (C, O_pad)    linear weight, zero-padded to lane-dense width
        # y_ref:  (nt, O_pad)   f32 pre-BN linear output for this tile
        # ps_ref: (1, 2, O_pad) per-tile BN partial sums [sum(y), sum(y*y)]
        # adaptive_avg_pool2d(1) + flatten: widening sublane reduce over HW — only the
        # (nt, C) accumulator is f32, no tile-sized f32 temporary.
        pooled = jnp.sum(x_ref[...], axis=1, dtype=jnp.float32) * inv_hw   # (nt, C)
        # Linear (bias omitted: exactly cancelled by training-mode BN centering).
        # bf16 operands keep the MXU off the critical path when the model is bf16.
        y = jnp.dot(pooled.astype(mxu_dtype), w_ref[...].astype(mxu_dtype),
                    preferred_element_type=jnp.float32)                    # (nt, O_pad)
        y_ref[...] = y
        # BN partial statistics, computed while y is live in vregs (VPU filler).
        sum_y = jnp.sum(y, axis=0, keepdims=True)                          # (1, O_pad)
        sum_y2 = jnp.sum(y * y, axis=0, keepdims=True)                     # (1, O_pad)
        ps_ref[0] = jnp.concatenate([sum_y, sum_y2], axis=0)               # (2, O_pad)
    return kernel


def _make_bn_kernel(inv_n):
    def kernel(ps_ref, g_ref, b_ref, y_ref, o_ref):
        # ps_ref: (num_tiles, 2, O_pad) per-tile partial sums (all tiles, tiny)
        # g_ref:  (1, O_pad) BN gamma (zero-padded)
        # b_ref:  (1, O_pad) BN beta  (zero-padded)
        # y_ref:  (nt, O_pad) f32 linear output tile
        # o_ref:  (nt, O_pad) bbox_deltas tile (padded)
        ps = ps_ref[...]
        sum_y = jnp.sum(ps[:, 0, :], axis=0, keepdims=True)                # (1, O_pad)
        sum_y2 = jnp.sum(ps[:, 1, :], axis=0, keepdims=True)               # (1, O_pad)
        mean = sum_y * inv_n                       # biased batch stats over REAL rows
        var = jnp.maximum(sum_y2 * inv_n - mean * mean, 0.0)
        # Fused affine: out = y * scale + shift.
        scale = g_ref[...].astype(jnp.float32) * jax.lax.rsqrt(var + BN_EPS)
        shift = b_ref[...].astype(jnp.float32) - mean * scale
        o_ref[...] = (y_ref[...] * scale + shift).astype(o_ref.dtype)
    return kernel


def coord_regressor(x, w, b, gamma, beta):
    """Pallas implementation of CoordRegressor.forward (RCNN_bbox_bn=True, training).

    x:      (N, C, H, W) or (N, C)
    w:      (C, O)  linear weight (transposed vs. PyTorch's (O, C))
    b:      (O,)    linear bias; exactly cancelled by the training-mode BN mean
                    subtraction, so it is not used (it is 0 at module init anyway).
                    NOTE: if BN is ever run with running statistics (eval mode), the
                    bias must be re-added — this implementation is training-mode only.
    gamma:  (O,)    BN weight
    beta:   (O,)    BN bias
    """
    del b  # cancelled by BN batch-mean centering (training mode); 0 at module init

    if x.ndim == 4:
        N, C, H, W = x.shape
        hw = H * W
        # Lane-dense layout: keep C on the 128-lane axis, HW on sublanes.  Contiguous
        # DMA + VPU sublane pool + MXU-ready pooled layout.  (A producer that emits
        # NHWC directly would avoid this wrapper transpose entirely.)
        x3 = jnp.transpose(x.reshape(N, C, hw), (0, 2, 1))                 # (N, HW, C)
    elif x.ndim == 2:
        N, C = x.shape
        hw = 1
        x3 = x[:, None, :]                                                 # (N, 1, C)
    else:
        raise ValueError("expected 2D or 4D input")

    O = w.shape[1]
    O_pad = _round_up(O, 128)          # lane-dense output width -> unmasked vst

    vmem_limit, pipeline_budget = _vmem_config()
    nt = _pick_row_tile(N, hw, C, x3.dtype.itemsize, O_pad, pipeline_budget)
    N_pad = _round_up(N, nt)
    num_tiles = N_pad // nt
    if N_pad != N:
        # Zero rows contribute 0 to the BN partial sums; the statistics divide by the
        # real N, and the padded output rows are sliced off below.
        x3 = jnp.pad(x3, ((0, N_pad - N), (0, 0), (0, 0)))

    # Zero-pad params to the lane-dense width.  Padded columns: sums = 0 -> mean = 0,
    # var = 0 -> rsqrt(eps) finite, gamma_pad = 0 -> scale = 0, shift = 0 -> output 0.
    w_pad = jnp.zeros((C, O_pad), w.dtype).at[:, :O].set(w)
    g_pad = jnp.zeros((1, O_pad), gamma.dtype).at[0, :O].set(gamma)
    beta_pad = jnp.zeros((1, O_pad), beta.dtype).at[0, :O].set(beta)

    mxu_dtype = jnp.bfloat16 if x3.dtype == jnp.bfloat16 else jnp.float32

    # Pass A: pool + linear + BN partial sums, tiled & pipelined over the ROI axis.
    y, partials = pl.pallas_call(
        _make_pool_linear_kernel(float(1.0 / hw), mxu_dtype),
        out_shape=(jax.ShapeDtypeStruct((N_pad, O_pad), jnp.float32),
                   jax.ShapeDtypeStruct((num_tiles, 2, O_pad), jnp.float32)),
        grid_spec=pltpu.PrefetchScalarGridSpec(
            num_scalar_prefetch=0,
            grid=(num_tiles,),
            in_specs=[
                pl.BlockSpec((nt, hw, C), lambda i: (i, 0, 0)),      # double-buffered x
                _const_block_spec((C, O_pad), lambda i: (0, 0)),     # weight, 1 buffer
            ],
            out_specs=[
                pl.BlockSpec((nt, O_pad), lambda i: (i, 0)),
                pl.BlockSpec((1, 2, O_pad), lambda i: (i, 0, 0)),
            ],
        ),
        compiler_params=pltpu.CompilerParams(
            dimension_semantics=("parallel",),       # 2 TensorCores on v7x
            vmem_limit_bytes=vmem_limit,
        ),
    )(x3, w_pad)

    # Pass B: training-mode BatchNorm1d affine, tiled over the same ROI axis.
    out = pl.pallas_call(
        _make_bn_kernel(float(1.0 / N)),             # REAL row count, not N_pad
        out_shape=jax.ShapeDtypeStruct((N_pad, O_pad), x.dtype),
        grid_spec=pltpu.PrefetchScalarGridSpec(
            num_scalar_prefetch=0,
            grid=(num_tiles,),
            in_specs=[
                _const_block_spec((num_tiles, 2, O_pad), lambda i: (0, 0, 0)),
                _const_block_spec((1, O_pad), lambda i: (0, 0)),
                _const_block_spec((1, O_pad), lambda i: (0, 0)),
                pl.BlockSpec((nt, O_pad), lambda i: (i, 0)),
            ],
            out_specs=pl.BlockSpec((nt, O_pad), lambda i: (i, 0)),
        ),
        compiler_params=pltpu.CompilerParams(
            dimension_semantics=("parallel",),
            vmem_limit_bytes=vmem_limit,
        ),
    )(partials, g_pad, beta_pad, y)

    return out[:N, :O]


def coord_regressor_ref(x, w, b, gamma, beta):
    """Pure-JAX reference for correctness checking."""
    if x.ndim == 4:
        x = jnp.mean(x, axis=(2, 3))
    y = x @ w + b
    mean = jnp.mean(y, axis=0, keepdims=True)
    var = jnp.mean(jnp.square(y - mean), axis=0, keepdims=True)
    return (y - mean) / jnp.sqrt(var + BN_EPS) * gamma + beta


if __name__ == "__main__":
    # Small deterministic problem: batch=16 ROIs, 32 channels, 16x16 spatial,
    # num_classes=2 -> output features = 4 * 2 = 8.  The tiler picks nt=8 here, so
    # the tiled (grid=(2,)) pipelined path and fused BN partial sums are exercised.
    N, C, H, W = 16, 32, 16, 16
    num_classes = 2
    O = 4 * num_classes

    key = jax.random.PRNGKey(0)
    k_x, k_w, k_g = jax.random.split(key, 3)

    x = jax.random.normal(k_x, (N, C, H, W), dtype=jnp.float32)

    # Parameter init matching the module's __init__:
    #   Linear weight ~ N(0, 0.01), bias = 0; BatchNorm1d weight ~ N(0, 0.01), bias = 0
    w_linear = 0.01 * jax.random.normal(k_w, (C, O), dtype=jnp.float32)  # (C, O) = PyTorch (O, C).T
    b_linear = jnp.zeros((O,), dtype=jnp.float32)
    bn_gamma = 0.01 * jax.random.normal(k_g, (O,), dtype=jnp.float32)
    bn_beta = jnp.zeros((O,), dtype=jnp.float32)

    out = coord_regressor(x, w_linear, b_linear, bn_gamma, bn_beta)
    out = jax.block_until_ready(out)

    ref = coord_regressor_ref(x, w_linear, b_linear, bn_gamma, bn_beta)
    assert out.shape == (N, O)
    assert jnp.allclose(out, ref, atol=1e-5, rtol=1e-5), "mismatch vs reference"

    print("KERNEL_OK")
</pallas_src>

<mosaic_0001>
module attributes {stable_mosaic.version = 11 : i64} {
  func.func @kernel(%arg0: i32, %arg1: memref<8x256x32xf32, #tpu.memory_space<vmem>>, %arg2: memref<32x128xf32, #tpu.memory_space<vmem>>, %arg3: memref<8x128xf32, #tpu.memory_space<vmem>>, %arg4: memref<1x2x128xf32, #tpu.memory_space<vmem>>) attributes {dimension_semantics = [#tpu.dimension_semantics<parallel>], iteration_bounds = array<i64: 2>, scalar_prefetch = 0 : i64, scratch_operands = 0 : i64, tpu.core_type = #tpu.core_type<tc>, window_params = [{transform_indices = @transform_0, window_bounds = array<i64: 8, 256, 32>}, {pipeline_mode = #tpu.pipeline_mode<synchronous>, transform_indices = @transform_1, window_bounds = array<i64: 32, 128>}, {transform_indices = @transform_2, window_bounds = array<i64: 8, 128>}, {transform_indices = @transform_3, window_bounds = array<i64: 1, 2, 128>}]} {
    %c0 = arith.constant 0 : index
    %c0_0 = arith.constant 0 : index
    %c0_1 = arith.constant 0 : index
    %0 = vector.load %arg1[%c0, %c0_0, %c0_1] : memref<8x256x32xf32, #tpu.memory_space<vmem>>, vector<8x256x32xf32>
    %cst = arith.constant dense<0.000000e+00> : vector<8x32xf32>
    %1 = vector.multi_reduction <add>, %0, %cst [1] : vector<8x256x32xf32> to vector<8x32xf32>
    %cst_2 = arith.constant 3.906250e-03 : f32
    %2 = vector.broadcast %cst_2 : f32 to vector<8x32xf32>
    %3 = arith.mulf %1, %2 : vector<8x32xf32>
    %c0_3 = arith.constant 0 : index
    %c0_4 = arith.constant 0 : index
    %4 = vector.load %arg2[%c0_3, %c0_4] : memref<32x128xf32, #tpu.memory_space<vmem>>, vector<32x128xf32>
    %cst_5 = arith.constant dense<0.000000e+00> : vector<8x128xf32>
    %5 = tpu.matmul %3, %4, %cst_5 {dimension_numbers = #tpu.dot_dimension_numbers<[1], [0], [0], [1], [0, 0, 1, 1], [], []>} : vector<8x32xf32>, vector<32x128xf32>, vector<8x128xf32> -> vector<8x128xf32>
    %c0_6 = arith.constant 0 : index
    %c0_7 = arith.constant 0 : index
    %6 = vector.load %arg3[%c0_6, %c0_7] : memref<8x128xf32, #tpu.memory_space<vmem>>, vector<8x128xf32>
    tpu.vector_store %arg3[%c0_6, %c0_7], %5 {strides = array<i32>} : memref<8x128xf32, #tpu.memory_space<vmem>>, vector<8x128xf32>,
    %cst_8 = arith.constant dense<0.000000e+00> : vector<128xf32>
    %7 = vector.multi_reduction <add>, %5, %cst_8 [0] : vector<8x128xf32> to vector<128xf32>
    %8 = vector.shape_cast %7 : vector<128xf32> to vector<1x128xf32>
    %9 = arith.mulf %5, %5 : vector<8x128xf32>
    %cst_9 = arith.constant dense<0.000000e+00> : vector<128xf32>
    %10 = vector.multi_reduction <add>, %9, %cst_9 [0] : vector<8x128xf32> to vector<128xf32>
    %11 = vector.shape_cast %10 : vector<128xf32> to vector<1x128xf32>
    %12 = tpu.concatenate %8, %11 in 0 : vector<1x128xf32>, vector<1x128xf32> -> vector<2x128xf32>
    %c0_10 = arith.constant 0 : index
    %c0_11 = arith.constant 0 : index
    %c0_12 = arith.constant 0 : index
    %13 = vector.load %arg4[%c0_10, %c0_11, %c0_12] : memref<1x2x128xf32, #tpu.memory_space<vmem>>, vector<1x2x128xf32>
    %14 = vector.shape_cast %13 : vector<1x2x128xf32> to vector<2x128xf32>
    %15 = vector.shape_cast %12 : vector<2x128xf32> to vector<1x2x128xf32>
    tpu.vector_store %arg4[%c0_10, %c0_11, %c0_12], %15 {strides = array<i32>} : memref<1x2x128xf32, #tpu.memory_space<vmem>>, vector<1x2x128xf32>,
    return
  }
  func.func @transform_0(%arg0: i32) -> (i32, i32, i32) {
    %c0_i32 = arith.constant 0 : i32
    %c0_i32_0 = arith.constant 0 : i32
    %c0_i32_1 = arith.constant 0 : i32
    return %arg0, %c0_i32, %c0_i32_0 : i32, i32, i32
  }
  func.func @transform_1(%arg0: i32) -> (i32, i32) {
    %c0_i32 = arith.constant 0 : i32
    %c0_i32_0 = arith.constant 0 : i32
    %c0_i32_1 = arith.constant 0 : i32
    return %c0_i32, %c0_i32_0 : i32, i32
  }
  func.func @transform_2(%arg0: i32) -> (i32, i32) {
    %c0_i32 = arith.constant 0 : i32
    %c0_i32_0 = arith.constant 0 : i32
    return %arg0, %c0_i32 : i32, i32
  }
  func.func @transform_3(%arg0: i32) -> (i32, i32, i32) {
    %c0_i32 = arith.constant 0 : i32
    %c0_i32_0 = arith.constant 0 : i32
    %c0_i32_1 = arith.constant 0 : i32
    return %arg0, %c0_i32, %c0_i32_0 : i32, i32, i32
  }
}

</mosaic_0001>

<bundles_post_ra>
// kernel: tpu_custom_call.1
= control target key start
LH: loop header
LB: loop body
LE: loop exit
PB: predicated region body
PF: predicated region fallthrough
CT: control target
= control target key end

     0   :  { %9 = vsyncpa [#allocation3], 0  ;;  %s2267_s0 = inlined_call_operand.vmem [shape: f32[16,256,32], index: 0, kind: input, shape index: {}]   ;;  %s2268_s1 = inlined_call_operand.vmem [shape: f32[32,128], index: 1, kind: input, shape index: {}]   ;;  %s2269_s2 = inlined_call_operand.hbm [shape: f32[16,128], index: 2, kind: output, shape index: {0}]   ;;  %s2270_s3 = inlined_call_operand.hbm [shape: f32[2,2,128], index: 3, kind: output, shape index: {1}]  }
   0x1   :  { %11 = vsyncpa [#allocation3 + $0x1], 0 }
   0x2   :  { %12 = vsyncpa [#allocation5], 0 }
   0x3   :  { %14 = vsyncpa [#allocation5 + $0x1], 0  ;;  %s1447_s12 = smov 0   ;;  %s1449_s13 = smov 0  }
   0x4   :  { %s1451_s14 = smov 0   ;;  %s1453_s15 = smov 0  }
   0x5 LB: > { %s1468_s16 = sadd.s32 4294967295, %s1420_s15   ;;  %s1240_s17 = sadd.s32 4294967294, %s1420_s15   ;;  %s1420_s15 = sphi %s1453_s15, %s2276_s15   ;;  %s1416_s14 = sphi %s1451_s14, %s2275_s14   ;;  %s1412_s13 = sphi %s1449_s13, %s2274_s13   ;;  %s1408_s12 = sphi %s1447_s12, %s2273_s12  }
   0x6   : > { %s1472_s18 = sadd.s32 1, %s1420_s15   ;;  %s74_s19 = sadd.s32 1, %s1416_s14 }
   0x7   : > { %s71_s20 = ssub.s32 %s1420_s15, %s1472_s18  ;;  %p84_p0 = scmp.ne.s32.totalorder %s1416_s14, %s1412_s13 }
   0x8   : > { %p72_p1 = scmp.eq.s32.totalorder %s71_s20, 0  ;;  %p85_p2 = scmp.eq.s32.totalorder %s1468_s16, 1 }
   0x9   : > { %p90_p3 = scmp.ne.s32.totalorder %s1412_s13, %s1408_s12  ;;  %p91_p4 = scmp.eq.s32.totalorder %s1240_s17, 1 }
   0xa   : > { %s1483_s21 = scalar_select %p72_p1, %s1416_s14, %s74_s19  }
   0xb   : > { %p1485_p5 = por %p85_p2, %p84_p0  ;;  %p1489_p6 = por %p91_p4, %p90_p3 }
   0xc   : > { %p1243_p7 = scmp.ge.s32.totalorder %s1420_s15, 1  ;;  %p148_p8 = scmp.lt.s32.totalorder %s1420_s15, 3 }
   0xe   : > { %p149_p9 = pnand %p1243_p7, %p148_p8 }
   0xf   : > { %s1246_s24 = sshll.u32 (!%p149_p9), %s1468_s16, 3  ;;  %vm441_vm0 = vcmask (!%p149_p9), 261120   ;;  %vm1423_vm1 = vmmov (!%p149_p9), 0   ;;  %vm1014_vm2 = vcmask (!%p149_p9), 1041409   ;;  %vm1016_vm3 = vcmask (!%p149_p9), 1042434   ;;  %s2186_s10 = sand.u32 (!%p149_p9), 1, %s1412_s13  }
  0x10   : > { %152 = sbr.rel (%p149_p9) target bundleno = 441 (0x1b9), region = 28  ;;  %p179_p10 = scmp.lt.s32.totalorder (!%p149_p9), %s1246_s24, 15  ;;  %vm1018_vm4 = vcmask (!%p149_p9), 1043459   ;;  %vm1020_vm5 = vcmask (!%p149_p9), 1044484   ;;  %vm1022_vm6 = vcmask (!%p149_p9), 1045509   ;;  %vm1024_vm7 = vcmask (!%p149_p9), 1046534  }
  0x11   : > { %vm1026_vm8 = vcmask (!%p149_p9), 1047559   ;;  %s1244_s11 = sshll.u32 (!%p149_p9), %s2186_s10, 3  ;;  %s1252_s17 = sshll.u32 (!%p149_p9), %s1468_s16, 7 }
  0x12   : > { %s170_s19 = scalar_lea.vmem (!%p149_p9), [#allocation2], %s1244_s11  ;;  %s2193_s26 = scalar_lea.hbm (!%p149_p9), %s2269_s2, %s1252_s17 }
  0x13   : > { %s1136_s20 = sshll.u32 (!%p149_p9), %s170_s19, 4  ;;  %s1118_s27 = scalar_lea.sflag (!%p149_p9), [#allocation3], %s2186_s10  ;;  %s2195_s20 = int_to_ptr.vmem [resolvable:$true] %s1136_s20 }
  0x14   : > { %s1425_s29 = smov (!%p149_p9), [#allocation2]  }
  0x15   : > { %s1330_s30 = sshll.u32 (!%p149_p9), %s1425_s29, 4  ;;  %s1331_s30 = int_to_ptr.vmem [resolvable:$false] %s1330_s30 }
  0x16   : > { %s1332_s4 = scalar_lea.vmem (!%p149_p9), %s1331_s30, 256  ;;  %p1333_p0 = scmp.lt.s32.totalorder (!%p149_p9), %s2195_s20, %s1331_s30 }
  0x17   : > { %s2278_s24 = smov (!%p179_p10, %s1246_s24), 15 }
  0x18   : > { %s1256_s25 = sshll.u32 %s2278_s24, 8 }
  0x19   : > { %s1499_s28 = scalar_lea.vmem %s2267_s0, %s1256_s25 }
  0x1a   : > { %v185_v0 = vld [vmem:[%s1499_s28] sm:$0xff]  ;;  %v186_v1 = vld [vmem:[%s1499_s28 + $0x8] sm:$0xff]  ;;  %v187_v2 = vld [vmem:[%s1499_s28 + $0x10] sm:$0xff] }
  0x1b   : > { %v188_v3 = vld [vmem:[%s1499_s28 + $0x18] sm:$0xff]  ;;  %v442_v4 = vsel %vm441_vm0, %v185_v0, 0.0  ;;  %v443_v5 = vsel %vm441_vm0, %v186_v1, 0.0  ;;  %v445_v6 = vsel %vm441_vm0, %v187_v2, 0.0  ;;  %v189_v7 = vld [vmem:[%s1499_s28 + $0x20] sm:$0xff]  ;;  %v190_v11 = vld [vmem:[%s1499_s28 + $0x28] sm:$0xff] }
  0x1c   : > { %v444_v8 = vadd.f32 %v443_v5, %v442_v4  ;;  %v447_v9 = vsel %vm441_vm0, %v188_v3, 0.0  ;;  %v449_v12 = vsel %vm441_vm0, %v189_v7, 0.0  ;;  %v451_v15 = vsel %vm441_vm0, %v190_v11, 0.0  ;;  %v191_v16 = vld [vmem:[%s1499_s28 + $0x30] sm:$0xff]  ;;  %v217_v17 = vld [vmem:[%s1499_s28 + $0x100] sm:$0xff]  ;;  %v218_v18 = vld [vmem:[%s1499_s28 + $0x108] sm:$0xff] }
  0x1d   : > { %v219_v19 = vld [vmem:[%s1499_s28 + $0x110] sm:$0xff]  ;;  %v220_v20 = vld [vmem:[%s1499_s28 + $0x118] sm:$0xff]  ;;  %v511_v22 = vsel %vm441_vm0, %v217_v17, 0.0  ;;  %v453_v23 = vsel %vm441_vm0, %v191_v16, 0.0  ;;  %v512_v24 = vsel %vm441_vm0, %v218_v18, 0.0  ;;  %v221_v27 = vld [vmem:[%s1499_s28 + $0x120] sm:$0xff] }
  0x1e   : > { %v446_v10 = vadd.f32 %v445_v6, %v444_v8  ;;  %v514_v25 = vsel %vm441_vm0, %v219_v19, 0.0  ;;  %v192_v26 = vld [vmem:[%s1499_s28 + $0x38] sm:$0xff]  ;;  %v513_v28 = vadd.f32 %v512_v24, %v511_v22  ;;  %v516_v29 = vsel %vm441_vm0, %v220_v20, 0.0  ;;  %v222_v30 = vld [vmem:[%s1499_s28 + $0x128] sm:$0xff]  ;;  %v193_v35 = vld [vmem:[%s1499_s28 + $0x40] sm:$0xff] }
  0x1f   : > { %v455_v33 = vsel %vm441_vm0, %v192_v26, 0.0  ;;  %v518_v34 = vsel %vm441_vm0, %v221_v27, 0.0  ;;  %v223_v36 = vld [vmem:[%s1499_s28 + $0x130] sm:$0xff]  ;;  %v520_v38 = vsel %vm441_vm0, %v222_v30, 0.0  ;;  %v224_v39 = vld [vmem:[%s1499_s28 + $0x138] sm:$0xff]  ;;  %v457_v42 = vsel %vm441_vm0, %v193_v35, 0.0 }
  0x20   : > { %v448_v13 = vadd.f32 %v447_v9, %v446_v10  ;;  %v515_v32 = vadd.f32 %v514_v25, %v513_v28  ;;  %v522_v43 = vsel %vm441_vm0, %v223_v36, 0.0  ;;  %v194_v44 = vld [vmem:[%s1499_s28 + $0x48] sm:$0xff]  ;;  %v249_v45 = vld [vmem:[%s1499_s28 + $0x200] sm:$0xff]  ;;  %v251_v48 = vld [vmem:[%s1499_s28 + $0x210] sm:$0xff]  ;;  %v524_v50 = vsel %vm441_vm0, %v224_v39, 0.0 }
  0x21   : > { %v250_v46 = vld [vmem:[%s1499_s28 + $0x208] sm:$0xff]  ;;  %v252_v49 = vld [vmem:[%s1499_s28 + $0x218] sm:$0xff]  ;;  %v580_v51 = vsel %vm441_vm0, %v249_v45, 0.0  ;;  %v253_v53 = vld [vmem:[%s1499_s28 + $0x220] sm:$0xff]  ;;  %v583_v57 = vsel %vm441_vm0, %v251_v48, 0.0  ;;  %v459_v59 = vsel %vm441_vm0, %v194_v44, 0.0 }
  0x22   : > { %v450_v14 = vadd.f32 %v449_v12, %v448_v13  ;;  %v517_v37 = vadd.f32 %v516_v29, %v515_v32  ;;  %v581_v52 = vsel %vm441_vm0, %v250_v46, 0.0  ;;  %v225_v58 = vld [vmem:[%s1499_s28 + $0x140] sm:$0xff]  ;;  %v585_v60 = vsel %vm441_vm0, %v252_v49, 0.0  ;;  %v195_v61 = vld [vmem:[%s1499_s28 + $0x50] sm:$0xff]  ;;  %v254_v62 = vld [vmem:[%s1499_s28 + $0x228] sm:$0xff] }
  0x23   : > { %v582_v56 = vadd.f32 %v581_v52, %v580_v51  ;;  %v587_v1 = vsel %vm441_vm0, %v253_v53, 0.0  ;;  %v526_v3 = vsel %vm441_vm0, %v225_v58, 0.0  ;;  %v226_v5 = vld [vmem:[%s1499_s28 + $0x148] sm:$0xff]  ;;  %v461_v6 = vsel %vm441_vm0, %v195_v61, 0.0  ;;  %v196_v8 = vld [vmem:[%s1499_s28 + $0x58] sm:$0xff]  ;;  %v255_v9 = vld [vmem:[%s1499_s28 + $0x230] sm:$0xff] }
  0x24   : > { %v452_v21 = vadd.f32 %v451_v15, %v450_v14  ;;  %v519_v41 = vadd.f32 %v518_v34, %v517_v37  ;;  %v589_v7 = vsel %vm441_vm0, %v254_v62, 0.0  ;;  %v227_v12 = vld [vmem:[%s1499_s28 + $0x150] sm:$0xff]  ;;  %v528_v14 = vsel %vm441_vm0, %v226_v5, 0.0  ;;  %v281_v16 = vld [vmem:[%s1499_s28 + $0x300] sm:$0xff]  ;;  %v282_v17 = vld [vmem:[%s1499_s28 + $0x308] sm:$0xff] }
  0x25   : > { %v584_v63 = vadd.f32 %v583_v57, %v582_v56  ;;  %v463_v18 = vsel %vm441_vm0, %v196_v8, 0.0  ;;  %v591_v19 = vsel %vm441_vm0, %v255_v9, 0.0  ;;  %v197_v20 = vld [vmem:[%s1499_s28 + $0x60] sm:$0xff]  ;;  %v283_v22 = vld [vmem:[%s1499_s28 + $0x310] sm:$0xff]  ;;  %v530_v25 = vsel %vm441_vm0, %v227_v12, 0.0  ;;  %v228_v30 = vld [vmem:[%s1499_s28 + $0x158] sm:$0xff] }
  0x26   : > { %v454_v31 = vadd.f32 %v453_v23, %v452_v21  ;;  %v521_v47 = vadd.f32 %v520_v38, %v519_v41  ;;  %v256_v21 = vld [vmem:[%s1499_s28 + $0x238] sm:$0xff]  ;;  %v649_v28 = vsel %vm441_vm0, %v281_v16, 0.0  ;;  %v650_v29 = vsel %vm441_vm0, %v282_v17, 0.0  ;;  %v198_v36 = vld [vmem:[%s1499_s28 + $0x68] sm:$0xff]  ;;  %v257_v37 = vld [vmem:[%s1499_s28 + $0x240] sm:$0xff] }
  0x27   : > { %v586_v4 = vadd.f32 %v585_v60, %v584_v63  ;;  %v284_v23 = vld [vmem:[%s1499_s28 + $0x318] sm:$0xff]  ;;  %v465_v32 = vsel %vm441_vm0, %v197_v20, 0.0  ;;  %v651_v34 = vadd.f32 %v650_v29, %v649_v28  ;;  %v652_v35 = vsel %vm441_vm0, %v283_v22, 0.0  ;;  %v286_v39 = vld [vmem:[%s1499_s28 + $0x328] sm:$0xff]  ;;  %v229_v46 = vld [vmem:[%s1499_s28 + $0x160] sm:$0xff] }
  0x28   : > { %v456_v40 = vadd.f32 %v455_v33, %v454_v31  ;;  %v523_v55 = vadd.f32 %v522_v43, %v521_v47  ;;  %v285_v31 = vld [vmem:[%s1499_s28 + $0x320] sm:$0xff]  ;;  %v593_v33 = vsel %vm441_vm0, %v256_v21, 0.0  ;;  %v654_v38 = vsel %vm441_vm0, %v284_v23, 0.0  ;;  %v287_v47 = vld [vmem:[%s1499_s28 + $0x330] sm:$0xff]  ;;  %v258_v52 = vld [vmem:[%s1499_s28 + $0x248] sm:$0xff] }
  0x29   : > { %v588_v10 = vadd.f32 %v587_v1, %v586_v4  ;;  %v653_v41 = vadd.f32 %v652_v35, %v651_v34  ;;  %v532_v43 = vsel %vm441_vm0, %v228_v30, 0.0  ;;  %v656_v45 = vsel %vm441_vm0, %v285_v31, 0.0  ;;  %v199_v51 = vld [vmem:[%s1499_s28 + $0x70] sm:$0xff]  ;;  %v201_v58 = vld [vmem:[%s1499_s28 + $0x80] sm:$0xff]  ;;  %v230_v1 = vld [vmem:[%s1499_s28 + $0x168] sm:$0xff] }
  0x2a   : > { %v458_v54 = vadd.f32 %v457_v42, %v456_v40  ;;  %v525_v0 = vadd.f32 %v524_v50, %v523_v55  ;;  %v467_v48 = vsel %vm441_vm0, %v198_v36, 0.0  ;;  %v595_v49 = vsel %vm441_vm0, %v257_v37, 0.0  ;;  %v288_v55 = vld [vmem:[%s1499_s28 + $0x338] sm:$0xff]  ;;  %v259_v8 = vld [vmem:[%s1499_s28 + $0x250] sm:$0xff]  ;;  %v209_v37 = vld [vmem:[%s1499_s28 + $0xc0] sm:$0xff] }
  0x2b   : > { %v590_v15 = vadd.f32 %v589_v7, %v588_v10  ;;  %v655_v50 = vadd.f32 %v654_v38, %v653_v41  ;;  %v658_v53 = vsel %vm441_vm0, %v286_v39, 0.0  ;;  %v534_v61 = vsel %vm441_vm0, %v229_v46, 0.0  ;;  %v205_v7 = vld [vmem:[%s1499_s28 + $0xa0] sm:$0xff]  ;;  %v207_v12 = vld [vmem:[%s1499_s28 + $0xb0] sm:$0xff]  ;;  %v208_v36 = vld [vmem:[%s1499_s28 + $0xb8] sm:$0xff] }
  0x2c   : > { %v460_v2 = vadd.f32 %v459_v59, %v458_v54  ;;  %v527_v11 = vadd.f32 %v526_v3, %v525_v0  ;;  %v200_v54 = vld [vmem:[%s1499_s28 + $0x78] sm:$0xff]  ;;  %v202_v59 = vld [vmem:[%s1499_s28 + $0x88] sm:$0xff]  ;;  %v660_v63 = vsel %vm441_vm0, %v287_v47, 0.0  ;;  %v203_v0 = vld [vmem:[%s1499_s28 + $0x90] sm:$0xff]  ;;  %v469_v3 = vsel %vm441_vm0, %v199_v51, 0.0 }
  0x2d   : > { %v592_v27 = vadd.f32 %v591_v19, %v590_v15  ;;  %v657_v57 = vadd.f32 %v656_v45, %v655_v50  ;;  %v597_v4 = vsel %vm441_vm0, %v258_v52, 0.0  ;;  %v471_v9 = vsel %vm441_vm0, %v200_v54, 0.0  ;;  %v260_v19 = vld [vmem:[%s1499_s28 + $0x258] sm:$0xff]  ;;  %v291_v30 = vld [vmem:[%s1499_s28 + $0x350] sm:$0xff]  ;;  %v317_v50 = vld [vmem:[%s1499_s28 + $0x420] sm:$0xff] }
  0x2e   : > { %v462_v13 = vadd.f32 %v461_v6, %v460_v2  ;;  %v529_v24 = vadd.f32 %v528_v14, %v527_v11  ;;  %v289_v2 = vld [vmem:[%s1499_s28 + $0x340] sm:$0xff]  ;;  %v204_v6 = vld [vmem:[%s1499_s28 + $0x98] sm:$0xff]  ;;  %v662_v10 = vsel %vm441_vm0, %v288_v55, 0.0  ;;  %v206_v11 = vld [vmem:[%s1499_s28 + $0xa8] sm:$0xff]  ;;  %v473_v14 = vsel %vm441_vm0, %v201_v58, 0.0 }
  0x2f   : > { %v594_v44 = vadd.f32 %v593_v33, %v592_v27  ;;  %v659_v5 = vadd.f32 %v658_v53, %v657_v57  ;;  %v1608_v15 = vsel %vm441_vm0, %v202_v59, 0.0  ;;  %v536_v21 = vsel %vm441_vm0, %v230_v1, 0.0  ;;  %v315_v31 = vld [vmem:[%s1499_s28 + $0x410] sm:$0xff]  ;;  %v316_v38 = vld [vmem:[%s1499_s28 + $0x418] sm:$0xff] }
  0x30   : > { %v464_v26 = vadd.f32 %v463_v18, %v462_v13  ;;  %v531_v40 = vadd.f32 %v530_v25, %v529_v24  ;;  %v290_v13 = vld [vmem:[%s1499_s28 + $0x348] sm:$0xff]  ;;  %v231_v18 = vld [vmem:[%s1499_s28 + $0x170] sm:$0xff]  ;;  %v664_v23 = vsel %vm441_vm0, %v289_v2, 0.0  ;;  %v313_v24 = vld [vmem:[%s1499_s28 + $0x400] sm:$0xff]  ;;  %v1620_v27 = vsel %vm441_vm0, %v204_v6, 0.0 }
  0x31   : > { %v596_v62 = vadd.f32 %v595_v49, %v594_v44  ;;  %v661_v17 = vadd.f32 %v660_v63, %v659_v5  ;;  %v314_v25 = vld [vmem:[%s1499_s28 + $0x408] sm:$0xff]  ;;  %v599_v28 = vsel %vm441_vm0, %v259_v8, 0.0  ;;  %v1629_v33 = vsel %vm441_vm0, %v206_v11, 0.0  ;;  %v211_v44 = vld [vmem:[%s1499_s28 + $0xd0] sm:$0xff]  ;;  %v232_v49 = vld [vmem:[%s1499_s28 + $0x178] sm:$0xff] }
  0x32   : > { %v466_v42 = vadd.f32 %v465_v32, %v464_v26  ;;  %v533_v56 = vadd.f32 %v532_v43, %v531_v40  ;;  %v1617_v26 = vsel %vm441_vm0, %v203_v0, 0.0  ;;  %v1626_v32 = vsel %vm441_vm0, %v205_v7, 0.0  ;;  %v210_v43 = vld [vmem:[%s1499_s28 + $0xc8] sm:$0xff]  ;;  %v212_v55 = vld [vmem:[%s1499_s28 + $0xd8] sm:$0xff]  ;;  %v319_v11 = vld [vmem:[%s1499_s28 + $0x430] sm:$0xff] }
  0x33   : > { %v598_v22 = vadd.f32 %v597_v4, %v596_v62  ;;  %v663_v29 = vadd.f32 %v662_v10, %v661_v17  ;;  %v1632_v34 = vsel %vm441_vm0, %v207_v12, 0.0  ;;  %v666_v35 = vsel %vm441_vm0, %v290_v13, 0.0  ;;  %v292_v57 = vld [vmem:[%s1499_s28 + $0x358] sm:$0xff]  ;;  %v214_v62 = vld [vmem:[%s1499_s28 + $0xe8] sm:$0xff]  ;;  %v215_v4 = vld [vmem:[%s1499_s28 + $0xf0] sm:$0xff] }
  0x34   : > { %v468_v60 = vadd.f32 %v467_v48, %v466_v42  ;;  %v535_v16 = vadd.f32 %v534_v61, %v533_v56  ;;  %v538_v40 = vsel %vm441_vm0, %v231_v18, 0.0  ;;  %v601_v41 = vsel %vm441_vm0, %v260_v19, 0.0  ;;  %v261_v56 = vld [vmem:[%s1499_s28 + $0x260] sm:$0xff]  ;;  %v318_v63 = vld [vmem:[%s1499_s28 + $0x428] sm:$0xff]  ;;  %v216_v5 = vld [vmem:[%s1499_s28 + $0xf8] sm:$0xff] }
  0x35   : > { %v665_v42 = vadd.f32 %v664_v23, %v663_v29  ;;  %v600_v46 = vadd.f32 %v599_v28, %v598_v22  ;;  %v718_v47 = vsel %vm441_vm0, %v313_v24, 0.0  ;;  %v719_v48 = vsel %vm441_vm0, %v314_v25, 0.0  ;;  %v213_v61 = vld [vmem:[%s1499_s28 + $0xe0] sm:$0xff]  ;;  %v262_v18 = vld [vmem:[%s1499_s28 + $0x268] sm:$0xff]  ;;  %v235_v24 = vld [vmem:[%s1499_s28 + $0x190] sm:$0xff] }
  0x36   : > { %v470_v20 = vadd.f32 %v469_v3, %v468_v60  ;;  %v537_v39 = vadd.f32 %v536_v21, %v535_v16  ;;  %v668_v52 = vsel %vm441_vm0, %v291_v30, 0.0  ;;  %v720_v53 = vadd.f32 %v719_v48, %v718_v47  ;;  %v233_v10 = vld [vmem:[%s1499_s28 + $0x180] sm:$0xff]  ;;  %v234_v23 = vld [vmem:[%s1499_s28 + $0x188] sm:$0xff]  ;;  %v320_v25 = vld [vmem:[%s1499_s28 + $0x438] sm:$0xff] }
  0x37   : > { %v667_v51 = vadd.f32 %v666_v35, %v665_v42  ;;  %v721_v54 = vsel %vm441_vm0, %v315_v31, 0.0  ;;  %v1652_v58 = vsel %vm441_vm0, %v208_v36, 0.0  ;;  %v1655_v59 = vsel %vm441_vm0, %v209_v37, 0.0  ;;  %v293_v19 = vld [vmem:[%s1499_s28 + $0x360] sm:$0xff]  ;;  %v236_v35 = vld [vmem:[%s1499_s28 + $0x198] sm:$0xff]  ;;  %v239_v47 = vld [vmem:[%s1499_s28 + $0x1b0] sm:$0xff] }
  0x38   : > { %v472_v45 = vadd.f32 %v471_v9, %v470_v20  ;;  %v723_v60 = vsel %vm441_vm0, %v316_v38, 0.0  ;;  %v1662_v0 = vsel %vm441_vm0, %v210_v43, 0.0  ;;  %v1665_v1 = vsel %vm441_vm0, %v211_v44, 0.0  ;;  %v237_v36 = vld [vmem:[%s1499_s28 + $0x1a0] sm:$0xff]  ;;  %v263_v48 = vld [vmem:[%s1499_s28 + $0x270] sm:$0xff] }
  0x39   : > { %v539_v2 = vadd.f32 %v538_v40, %v537_v39  ;;  %v722_v3 = vadd.f32 %v721_v54, %v720_v53  ;;  %v540_v6 = vsel %vm441_vm0, %v232_v49, 0.0  ;;  %v602_v7 = vadd.f32 %v601_v41, %v600_v46  ;;  %v238_v41 = vld [vmem:[%s1499_s28 + $0x1a8] sm:$0xff]  ;;  %v321_v42 = vld [vmem:[%s1499_s28 + $0x440] sm:$0xff]  ;;  %v240_v53 = vld [vmem:[%s1499_s28 + $0x1b8] sm:$0xff] }
  0x3a   : > { %v669_v8 = vadd.f32 %v668_v52, %v667_v51  ;;  %v725_v9 = vsel %vm441_vm0, %v317_v50, 0.0  ;;  %v474_v12 = vadd.f32 %v473_v14, %v472_v45  ;;  %v603_v13 = vsel %vm441_vm0, %v261_v56, 0.0  ;;  %v294_v49 = vld [vmem:[%s1499_s28 + $0x368] sm:$0xff] }
  0x3b   : > { %v670_v16 = vsel %vm441_vm0, %v292_v57, 0.0  ;;  %v724_v17 = vadd.f32 %v723_v60, %v722_v3  ;;  %v1678_v20 = vsel %vm441_vm0, %v212_v55, 0.0  ;;  %v1681_v21 = vsel %vm441_vm0, %v213_v61, 0.0  ;;  %v322_v54 = vld [vmem:[%s1499_s28 + $0x448] sm:$0xff] }
  0x3c   : > { %v1684_v22 = vsel %vm441_vm0, %v214_v62, 0.0  ;;  %v727_v14 = vsel %vm441_vm0, %v318_v63, 0.0  ;;  %v1691_v28 = vsel %vm441_vm0, %v215_v4, 0.0  ;;  %v1694_v29 = vsel %vm441_vm0, %v216_v5, 0.0  ;;  %v242_v61 = vld [vmem:[%s1499_s28 + $0x1c8] sm:$0xff]  ;;  %v243_v62 = vld [vmem:[%s1499_s28 + $0x1d0] sm:$0xff] }
  0x3d   : > { %v541_v30 = vadd.f32 %v540_v6, %v539_v2  ;;  %v726_v31 = vadd.f32 %v725_v9, %v724_v17  ;;  %v542_v37 = vsel %vm441_vm0, %v233_v10, 0.0  ;;  %v604_v38 = vadd.f32 %v603_v13, %v602_v7  ;;  %v244_v5 = vld [vmem:[%s1499_s28 + $0x1d8] sm:$0xff]  ;;  %v323_v6 = vld [vmem:[%s1499_s28 + $0x450] sm:$0xff] }
  0x3e   : > { %v671_v39 = vadd.f32 %v670_v16, %v669_v8  ;;  %v729_v40 = vsel %vm441_vm0, %v319_v11, 0.0  ;;  %v476_v43 = vadd.f32 %v1608_v15, %v474_v12  ;;  %v605_v44 = vsel %vm441_vm0, %v262_v18, 0.0  ;;  %v241_v15 = vld [vmem:[%s1499_s28 + $0x1c0] sm:$0xff]  ;;  %v264_v11 = vld [vmem:[%s1499_s28 + $0x278] sm:$0xff]  ;;  %v295_v12 = vld [vmem:[%s1499_s28 + $0x370] sm:$0xff] }
  0x3f   : > { %v672_v45 = vsel %vm441_vm0, %v293_v19, 0.0  ;;  %v728_v46 = vadd.f32 %v727_v14, %v726_v31  ;;  %v544_v50 = vsel %vm441_vm0, %v234_v23, 0.0  ;;  %v546_v51 = vsel %vm441_vm0, %v235_v24, 0.0  ;;  %v245_v18 = vld [vmem:[%s1499_s28 + $0x1e0] sm:$0xff]  ;;  %v246_v19 = vld [vmem:[%s1499_s28 + $0x1e8] sm:$0xff]  ;;  %v324_v14 = vld [vmem:[%s1499_s28 + $0x458] sm:$0xff] }
  0x40   : > { %v731_v52 = vsel %vm441_vm0, %v320_v25, 0.0  ;;  %v543_v55 = vadd.f32 %v542_v37, %v541_v30  ;;  %v1715_v56 = vsel %vm441_vm0, %v236_v35, 0.0  ;;  %v1718_v57 = vsel %vm441_vm0, %v237_v36, 0.0  ;;  %v247_v31 = vld [vmem:[%s1499_s28 + $0x1f0] sm:$0xff]  ;;  %v248_v35 = vld [vmem:[%s1499_s28 + $0x1f8] sm:$0xff] }
  0x41   : > { %v730_v60 = vadd.f32 %v729_v40, %v728_v46  ;;  %v1723_v63 = vsel %vm441_vm0, %v238_v41, 0.0  ;;  %v606_v2 = vadd.f32 %v605_v44, %v604_v38  ;;  %v673_v3 = vadd.f32 %v672_v45, %v671_v39  ;;  %v265_v40 = vld [vmem:[%s1499_s28 + $0x280] sm:$0xff]  ;;  %v266_v46 = vld [vmem:[%s1499_s28 + $0x288] sm:$0xff] }
  0x42   : > { %v733_v4 = vsel %vm441_vm0, %v321_v42, 0.0  ;;  %v478_v7 = vadd.f32 %v1617_v26, %v476_v43  ;;  %v607_v8 = vsel %vm441_vm0, %v263_v48, 0.0  ;;  %v674_v9 = vsel %vm441_vm0, %v294_v49, 0.0  ;;  %v325_v41 = vld [vmem:[%s1499_s28 + $0x460] sm:$0xff] }
  0x43   : > { %v732_v10 = vadd.f32 %v731_v52, %v730_v60  ;;  %v1734_v13 = vsel %vm441_vm0, %v239_v47, 0.0  ;;  %v1737_v16 = vsel %vm441_vm0, %v240_v53, 0.0  ;;  %v1740_v17 = vsel %vm441_vm0, %v241_v15, 0.0  ;;  %v296_v47 = vld [vmem:[%s1499_s28 + $0x378] sm:$0xff]  ;;  %v345_v48 = vld [vmem:[%s1499_s28 + $0x500] sm:$0xff]  ;;  %v346_v53 = vld [vmem:[%s1499_s28 + $0x508] sm:$0xff] }
  0x44   : > { %v735_v26 = vsel %vm441_vm0, %v322_v54, 0.0  ;;  %v545_v23 = vadd.f32 %v544_v50, %v543_v55  ;;  %v1747_v24 = vsel %vm441_vm0, %v242_v61, 0.0  ;;  %v1750_v25 = vsel %vm441_vm0, %v243_v62, 0.0  ;;  %v347_v15 = vld [vmem:[%s1499_s28 + $0x510] sm:$0xff] }
  0x45   : > { %v734_v30 = vadd.f32 %v733_v4, %v732_v10  ;;  %v1755_v36 = vsel %vm441_vm0, %v244_v5, 0.0  ;;  %v608_v37 = vadd.f32 %v607_v8, %v606_v2  ;;  %v675_v38 = vadd.f32 %v674_v9, %v673_v3  ;;  %v267_v62 = vld [vmem:[%s1499_s28 + $0x290] sm:$0xff] }
  0x46   : > { %v737_v39 = vsel %vm441_vm0, %v323_v6, 0.0  ;;  %v480_v42 = vadd.f32 %v1620_v27, %v478_v7  ;;  %v609_v43 = vsel %vm441_vm0, %v264_v11, 0.0  ;;  %v676_v44 = vsel %vm441_vm0, %v295_v12, 0.0  ;;  %v326_v27 = vld [vmem:[%s1499_s28 + $0x468] sm:$0xff]  ;;  %v327_v6 = vld [vmem:[%s1499_s28 + $0x470] sm:$0xff]  ;;  %v268_v11 = vld [vmem:[%s1499_s28 + $0x298] sm:$0xff] }
  0x47   : > { %v736_v45 = vadd.f32 %v735_v26, %v734_v30  ;;  %v1767_v49 = vsel %vm441_vm0, %v245_v18, 0.0  ;;  %v1770_v50 = vsel %vm441_vm0, %v246_v19, 0.0  ;;  %v739_v52 = vsel %vm441_vm0, %v324_v14, 0.0  ;;  %v297_v12 = vld [vmem:[%s1499_s28 + $0x380] sm:$0xff] }
  0x48   : > { %v547_v54 = vadd.f32 %v546_v51, %v545_v23  ;;  %v1777_v55 = vsel %vm441_vm0, %v247_v31, 0.0  ;;  %v1780_v60 = vsel %vm441_vm0, %v248_v35, 0.0  ;;  %v610_v2 = vadd.f32 %v609_v43, %v608_v37  ;;  %v348_v51 = vld [vmem:[%s1499_s28 + $0x518] sm:$0xff]  ;;  %v269_v23 = vld [vmem:[%s1499_s28 + $0x2a0] sm:$0xff] }
  0x49   : > { %v738_v61 = vadd.f32 %v737_v39, %v736_v45  ;;  %v611_v3 = vsel %vm441_vm0, %v265_v40, 0.0  ;;  %v677_v4 = vadd.f32 %v676_v44, %v675_v38  ;;  %v741_v5 = vsel %vm441_vm0, %v325_v41, 0.0  ;;  %v349_v30 = vld [vmem:[%s1499_s28 + $0x520] sm:$0xff]  ;;  %v270_v39 = vld [vmem:[%s1499_s28 + $0x2a8] sm:$0xff]  ;;  %v271_v44 = vld [vmem:[%s1499_s28 + $0x2b0] sm:$0xff] }
  0x4a   : > { %v482_v7 = vadd.f32 %v1626_v32, %v480_v42  ;;  %v678_v8 = vsel %vm441_vm0, %v296_v47, 0.0  ;;  %v787_v10 = vsel %vm441_vm0, %v345_v48, 0.0  ;;  %v613_v26 = vsel %vm441_vm0, %v266_v46, 0.0  ;;  %v328_v32 = vld [vmem:[%s1499_s28 + $0x478] sm:$0xff]  ;;  %v350_v45 = vld [vmem:[%s1499_s28 + $0x528] sm:$0xff] }
  0x4b   : > { %v740_v9 = vadd.f32 %v739_v52, %v738_v61  ;;  %v743_v18 = vsel %vm441_vm0, %v326_v27, 0.0  ;;  %v788_v19 = vsel %vm441_vm0, %v346_v53, 0.0  ;;  %v790_v14 = vsel %vm441_vm0, %v347_v15, 0.0  ;;  %v272_v52 = vld [vmem:[%s1499_s28 + $0x2b8] sm:$0xff]  ;;  %v298_v27 = vld [vmem:[%s1499_s28 + $0x388] sm:$0xff]  ;;  %v273_v61 = vld [vmem:[%s1499_s28 + $0x2c0] sm:$0xff] }
  0x4c   : > { %v549_v31 = vadd.f32 %v1715_v56, %v547_v54  ;;  %v615_v35 = vsel %vm441_vm0, %v267_v62, 0.0  ;;  %v789_v38 = vadd.f32 %v788_v19, %v787_v10  ;;  %v612_v40 = vadd.f32 %v611_v3, %v610_v2  ;;  %v329_v62 = vld [vmem:[%s1499_s28 + $0x480] sm:$0xff]  ;;  %v351_v2 = vld [vmem:[%s1499_s28 + $0x530] sm:$0xff] }
  0x4d   : > { %v742_v37 = vadd.f32 %v741_v5, %v740_v9  ;;  %v679_v41 = vadd.f32 %v678_v8, %v677_v4  ;;  %v745_v42 = vsel %vm441_vm0, %v327_v6, 0.0  ;;  %v792_v43 = vsel %vm441_vm0, %v348_v51, 0.0  ;;  %v274_v51 = vld [vmem:[%s1499_s28 + $0x2c8] sm:$0xff] }
  0x4e   : > { %v484_v46 = vadd.f32 %v1629_v33, %v482_v7  ;;  %v680_v56 = vsel %vm441_vm0, %v297_v12, 0.0  ;;  %v791_v48 = vadd.f32 %v790_v14, %v789_v38  ;;  %v1811_v53 = vsel %vm441_vm0, %v268_v11, 0.0  ;;  %v275_v7 = vld [vmem:[%s1499_s28 + $0x2d0] sm:$0xff]  ;;  %v352_v12 = vld [vmem:[%s1499_s28 + $0x538] sm:$0xff]  ;;  %v278_v38 = vld [vmem:[%s1499_s28 + $0x2e8] sm:$0xff] }
  0x4f   : > { %v744_v47 = vadd.f32 %v743_v18, %v742_v37  ;;  %v1814_v15 = vsel %vm441_vm0, %v269_v23, 0.0  ;;  %v747_v54 = vsel %vm441_vm0, %v328_v32, 0.0  ;;  %v794_v33 = vsel %vm441_vm0, %v349_v30, 0.0  ;;  %v299_v32 = vld [vmem:[%s1499_s28 + $0x390] sm:$0xff] }
  0x50   : > { %v551_v3 = vadd.f32 %v1718_v57, %v549_v31  ;;  %v1823_v4 = vsel %vm441_vm0, %v270_v39, 0.0  ;;  %v793_v6 = vadd.f32 %v792_v43, %v791_v48  ;;  %v614_v8 = vadd.f32 %v613_v26, %v612_v40  ;;  %v276_v57 = vld [vmem:[%s1499_s28 + $0x2d8] sm:$0xff]  ;;  %v277_v26 = vld [vmem:[%s1499_s28 + $0x2e0] sm:$0xff]  ;;  %v330_v39 = vld [vmem:[%s1499_s28 + $0x488] sm:$0xff] }
  0x51   : > { %v746_v5 = vadd.f32 %v745_v42, %v744_v47  ;;  %v1828_v9 = vsel %vm441_vm0, %v271_v44, 0.0  ;;  %v681_v10 = vadd.f32 %v680_v56, %v679_v41  ;;  %v796_v11 = vsel %vm441_vm0, %v350_v45, 0.0  ;;  %v353_v40 = vld [vmem:[%s1499_s28 + $0x540] sm:$0xff]  ;;  %v279_v45 = vld [vmem:[%s1499_s28 + $0x2f0] sm:$0xff] }
  0x52   : > { %v486_v18 = vadd.f32 %v1632_v34, %v484_v46  ;;  %v682_v19 = vsel %vm441_vm0, %v298_v27, 0.0  ;;  %v795_v23 = vadd.f32 %v794_v33, %v793_v6  ;;  %v1838_v30 = vsel %vm441_vm0, %v272_v52, 0.0  ;;  %v280_v46 = vld [vmem:[%s1499_s28 + $0x2f8] sm:$0xff]  ;;  %v354_v27 = vld [vmem:[%s1499_s28 + $0x548] sm:$0xff] }
  0x53   : > { %v748_v14 = vadd.f32 %v747_v54, %v746_v5  ;;  %v1841_v31 = vsel %vm441_vm0, %v273_v61, 0.0  ;;  %v749_v37 = vsel %vm441_vm0, %v329_v62, 0.0  ;;  %v798_v34 = vsel %vm441_vm0, %v351_v2, 0.0  ;;  %v300_v52 = vld [vmem:[%s1499_s28 + $0x398] sm:$0xff]  ;;  %v302_v2 = vld [vmem:[%s1499_s28 + $0x3a8] sm:$0xff] }
  0x54   : > { %v553_v41 = vadd.f32 %v1723_v63, %v551_v3  ;;  %v1850_v42 = vsel %vm441_vm0, %v274_v51, 0.0  ;;  %v1853_v43 = vsel %vm441_vm0, %v275_v7, 0.0  ;;  %v797_v44 = vadd.f32 %v796_v11, %v795_v23  ;;  %v303_v51 = vld [vmem:[%s1499_s28 + $0x3b0] sm:$0xff] }
  0x55   : > { %v616_v56 = vadd.f32 %v615_v35, %v614_v8  ;;  %v1858_v47 = vsel %vm441_vm0, %v276_v57, 0.0  ;;  %v683_v48 = vadd.f32 %v682_v19, %v681_v10  ;;  %v800_v63 = vsel %vm441_vm0, %v352_v12, 0.0  ;;  %v301_v35 = vld [vmem:[%s1499_s28 + $0x3a0] sm:$0xff]  ;;  %v331_v7 = vld [vmem:[%s1499_s28 + $0x490] sm:$0xff] }
  0x56   : > { %v488_v54 = vadd.f32 %v1652_v58, %v486_v18  ;;  %v684_v33 = vsel %vm441_vm0, %v299_v32, 0.0  ;;  %v750_v61 = vadd.f32 %v749_v37, %v748_v14  ;;  %v799_v62 = vadd.f32 %v798_v34, %v797_v44  ;;  %v355_v8 = vld [vmem:[%s1499_s28 + $0x550] sm:$0xff]  ;;  %v304_v18 = vld [vmem:[%s1499_s28 + $0x3b8] sm:$0xff]  ;;  %v305_v19 = vld [vmem:[%s1499_s28 + $0x3c0] sm:$0xff] }
  0x57   : > { %v1868_v3 = vsel %vm441_vm0, %v277_v26, 0.0  ;;  %v1871_v5 = vsel %vm441_vm0, %v278_v38, 0.0  ;;  %v751_v6 = vsel %vm441_vm0, %v330_v39, 0.0  ;;  %v802_v58 = vsel %vm441_vm0, %v353_v40, 0.0  ;;  %v306_v32 = vld [vmem:[%s1499_s28 + $0x3c8] sm:$0xff]  ;;  %v356_v37 = vld [vmem:[%s1499_s28 + $0x558] sm:$0xff] }
  0x58   : > { %v555_v10 = vadd.f32 %v1734_v13, %v553_v41  ;;  %v1880_v11 = vsel %vm441_vm0, %v279_v45, 0.0  ;;  %v1883_v57 = vsel %vm441_vm0, %v280_v46, 0.0  ;;  %v801_v12 = vadd.f32 %v800_v63, %v799_v62  ;;  %v332_v41 = vld [vmem:[%s1499_s28 + $0x498] sm:$0xff]  ;;  %v377_v44 = vld [vmem:[%s1499_s28 + $0x600] sm:$0xff]  ;;  %v379_v63 = vld [vmem:[%s1499_s28 + $0x610] sm:$0xff] }
  0x59   : > { %v618_v14 = vadd.f32 %v1811_v53, %v616_v56  ;;  %v685_v23 = vadd.f32 %v684_v33, %v683_v48  ;;  %v686_v26 = vsel %vm441_vm0, %v300_v52, 0.0  ;;  %v804_v13 = vsel %vm441_vm0, %v354_v27, 0.0  ;;  %v357_v48 = vld [vmem:[%s1499_s28 + $0x560] sm:$0xff] }
  0x5a   : > { %v490_v34 = vadd.f32 %v1655_v59, %v488_v54  ;;  %v688_v38 = vsel %vm441_vm0, %v301_v35, 0.0  ;;  %v752_v39 = vadd.f32 %v751_v6, %v750_v61  ;;  %v803_v40 = vadd.f32 %v802_v58, %v801_v12  ;;  %v378_v59 = vld [vmem:[%s1499_s28 + $0x608] sm:$0xff]  ;;  %v307_v61 = vld [vmem:[%s1499_s28 + $0x3d0] sm:$0xff]  ;;  %v380_v58 = vld [vmem:[%s1499_s28 + $0x618] sm:$0xff] }
  0x5b   : > { %v690_v53 = vsel %vm441_vm0, %v302_v2, 0.0  ;;  %v1898_v45 = vsel %vm441_vm0, %v303_v51, 0.0  ;;  %v753_v46 = vsel %vm441_vm0, %v331_v7, 0.0  ;;  %v806_v56 = vsel %vm441_vm0, %v355_v8, 0.0  ;;  %v308_v12 = vld [vmem:[%s1499_s28 + $0x3d8] sm:$0xff] }
  0x5c   : > { %v557_v52 = vadd.f32 %v1737_v16, %v555_v10  ;;  %v1907_v27 = vsel %vm441_vm0, %v304_v18, 0.0  ;;  %v1910_v54 = vsel %vm441_vm0, %v305_v19, 0.0  ;;  %v805_v33 = vadd.f32 %v804_v13, %v803_v40  ;;  %v358_v16 = vld [vmem:[%s1499_s28 + $0x568] sm:$0xff]  ;;  %v381_v13 = vld [vmem:[%s1499_s28 + $0x620] sm:$0xff] }
  0x5d   : > { %v620_v62 = vadd.f32 %v1814_v15, %v618_v14  ;;  %v687_v35 = vadd.f32 %v686_v26, %v685_v23  ;;  %v1915_v2 = vsel %vm441_vm0, %v306_v32, 0.0  ;;  %v808_v6 = vsel %vm441_vm0, %v356_v37, 0.0  ;;  %v333_v23 = vld [vmem:[%s1499_s28 + $0x4a0] sm:$0xff]  ;;  %v359_v26 = vld [vmem:[%s1499_s28 + $0x570] sm:$0xff] }
  0x5e   : > { %v492_v51 = vadd.f32 %v1662_v0, %v490_v34  ;;  %v754_v7 = vadd.f32 %v753_v46, %v752_v39  ;;  %v807_v8 = vadd.f32 %v806_v56, %v805_v33  ;;  %v856_v10 = vsel %vm441_vm0, %v377_v44, 0.0  ;;  %v309_v39 = vld [vmem:[%s1499_s28 + $0x3e0] sm:$0xff]  ;;  %v360_v56 = vld [vmem:[%s1499_s28 + $0x578] sm:$0xff]  ;;  %v310_v33 = vld [vmem:[%s1499_s28 + $0x3e8] sm:$0xff] }
  0x5f   : > { %v755_v15 = vsel %vm441_vm0, %v332_v41, 0.0  ;;  %v810_v18 = vsel %vm441_vm0, %v357_v48, 0.0  ;;  %v857_v19 = vsel %vm441_vm0, %v378_v59, 0.0  ;;  %v859_v14 = vsel %vm441_vm0, %v379_v63, 0.0  ;;  %v382_v48 = vld [vmem:[%s1499_s28 + $0x628] sm:$0xff] }
  0x60   : > { %v559_v0 = vadd.f32 %v1740_v17, %v557_v52  ;;  %v1932_v32 = vsel %vm441_vm0, %v307_v61, 0.0  ;;  %v809_v37 = vadd.f32 %v808_v6, %v807_v8  ;;  %v858_v34 = vadd.f32 %v857_v19, %v856_v10  ;;  %v361_v6 = vld [vmem:[%s1499_s28 + $0x580] sm:$0xff]  ;;  %v362_v19 = vld [vmem:[%s1499_s28 + $0x588] sm:$0xff] }
  0x61   : > { %v622_v40 = vadd.f32 %v1823_v4, %v620_v62  ;;  %v689_v41 = vadd.f32 %v688_v38, %v687_v35  ;;  %v812_v44 = vsel %vm441_vm0, %v358_v16, 0.0  ;;  %v861_v46 = vsel %vm441_vm0, %v380_v58, 0.0  ;;  %v334_v35 = vld [vmem:[%s1499_s28 + $0x4a8] sm:$0xff]  ;;  %v383_v16 = vld [vmem:[%s1499_s28 + $0x630] sm:$0xff] }
  0x62   : > { %v1941_v17 = vsel %vm441_vm0, %v308_v12, 0.0  ;;  %v756_v59 = vadd.f32 %v755_v15, %v754_v7  ;;  %v811_v63 = vadd.f32 %v810_v18, %v809_v37  ;;  %v860_v52 = vadd.f32 %v859_v14, %v858_v34  ;;  %v384_v14 = vld [vmem:[%s1499_s28 + $0x638] sm:$0xff] }
  0x63   : > { %v494_v61 = vadd.f32 %v1665_v1, %v492_v51  ;;  %v757_v4 = vsel %vm441_vm0, %v333_v23, 0.0  ;;  %v814_v38 = vsel %vm441_vm0, %v359_v26, 0.0  ;;  %v863_v62 = vsel %vm441_vm0, %v381_v13, 0.0  ;;  %v311_v1 = vld [vmem:[%s1499_s28 + $0x3f0] sm:$0xff] }
  0x64   : > { %v561_v58 = vadd.f32 %v1747_v24, %v559_v0  ;;  %v1953_v7 = vsel %vm441_vm0, %v309_v39, 0.0  ;;  %v813_v8 = vadd.f32 %v812_v44, %v811_v63  ;;  %v862_v10 = vadd.f32 %v861_v46, %v860_v52  ;;  %v312_v0 = vld [vmem:[%s1499_s28 + $0x3f8] sm:$0xff]  ;;  %v335_v39 = vld [vmem:[%s1499_s28 + $0x4b0] sm:$0xff] }
  0x65   : > { %v624_v51 = vadd.f32 %v1828_v9, %v622_v40  ;;  %v691_v12 = vadd.f32 %v690_v53, %v689_v41  ;;  %v816_v15 = vsel %vm441_vm0, %v360_v56, 0.0  ;;  %v865_v18 = vsel %vm441_vm0, %v382_v48, 0.0  ;;  %v363_v40 = vld [vmem:[%s1499_s28 + $0x590] sm:$0xff]  ;;  %v385_v41 = vld [vmem:[%s1499_s28 + $0x640] sm:$0xff]  ;;  %v336_v48 = vld [vmem:[%s1499_s28 + $0x4b8] sm:$0xff] }
  0x66   : > { %v1962_v24 = vsel %vm441_vm0, %v310_v33, 0.0  ;;  %v758_v23 = vadd.f32 %v757_v4, %v756_v59  ;;  %v815_v26 = vadd.f32 %v814_v38, %v813_v8  ;;  %v864_v13 = vadd.f32 %v863_v62, %v862_v10  ;;  %v409_v10 = vld [vmem:[%s1499_s28 + $0x700] sm:$0xff] }
  0x67   : > { %v496_v37 = vadd.f32 %v1678_v20, %v494_v61  ;;  %v759_v9 = vsel %vm441_vm0, %v334_v35, 0.0  ;;  %v818_v53 = vsel %vm441_vm0, %v361_v6, 0.0  ;;  %v867_v34 = vsel %vm441_vm0, %v383_v16, 0.0  ;;  %v364_v61 = vld [vmem:[%s1499_s28 + $0x598] sm:$0xff]  ;;  %v365_v6 = vld [vmem:[%s1499_s28 + $0x5a0] sm:$0xff] }
  0x68   : > { %v563_v44 = vadd.f32 %v1750_v25, %v561_v58  ;;  %v1974_v46 = vsel %vm441_vm0, %v311_v1, 0.0  ;;  %v817_v56 = vadd.f32 %v816_v15, %v815_v26  ;;  %v866_v20 = vadd.f32 %v865_v18, %v864_v13  ;;  %v386_v25 = vld [vmem:[%s1499_s28 + $0x648] sm:$0xff] }
  0x69   : > { %v626_v59 = vadd.f32 %v1838_v30, %v624_v51  ;;  %v693_v63 = vadd.f32 %v1898_v45, %v691_v12  ;;  %v820_v52 = vsel %vm441_vm0, %v362_v19, 0.0  ;;  %v869_v33 = vsel %vm441_vm0, %v384_v14, 0.0  ;;  %v387_v30 = vld [vmem:[%s1499_s28 + $0x650] sm:$0xff]  ;;  %v410_v1 = vld [vmem:[%s1499_s28 + $0x708] sm:$0xff]  ;;  %v337_v19 = vld [vmem:[%s1499_s28 + $0x4c0] sm:$0xff] }
  0x6a   : > { %v1984_v4 = vsel %vm441_vm0, %v312_v0, 0.0  ;;  %v760_v38 = vadd.f32 %v759_v9, %v758_v23  ;;  %v819_v62 = vadd.f32 %v818_v53, %v817_v56  ;;  %v868_v35 = vadd.f32 %v867_v34, %v866_v20  ;;  %v411_v51 = vld [vmem:[%s1499_s28 + $0x710] sm:$0xff]  ;;  %v366_v0 = vld [vmem:[%s1499_s28 + $0x5a8] sm:$0xff]  ;;  %v389_v56 = vld [vmem:[%s1499_s28 + $0x660] sm:$0xff] }
  0x6b   : > { %v1989_v16 = vadd.f32 %v1681_v21, %v496_v37  ;;  %v761_v45 = vsel %vm441_vm0, %v335_v39, 0.0  ;;  %v822_v58 = vsel %vm441_vm0, %v363_v40, 0.0  ;;  %v871_v8 = vsel %vm441_vm0, %v385_v41, 0.0  ;;  %v388_v37 = vld [vmem:[%s1499_s28 + $0x658] sm:$0xff]  ;;  %v413_v20 = vld [vmem:[%s1499_s28 + $0x720] sm:$0xff] }
  0x6c   : > { %v1998_v12 = vadd.f32 %v1755_v36, %v563_v44  ;;  %v763_v15 = vsel %vm441_vm0, %v336_v48, 0.0  ;;  %v821_v18 = vadd.f32 %v820_v52, %v819_v62  ;;  %v870_v21 = vadd.f32 %v869_v33, %v868_v35  ;;  %v412_v36 = vld [vmem:[%s1499_s28 + $0x718] sm:$0xff]  ;;  %v367_v44 = vld [vmem:[%s1499_s28 + $0x5b0] sm:$0xff]  ;;  %v338_v33 = vld [vmem:[%s1499_s28 + $0x4c8] sm:$0xff] }
  0x6d   : > { %v628_v14 = vadd.f32 %v1841_v31, %v626_v59  ;;  %v695_v23 = vadd.f32 %v1907_v27, %v693_v63  ;;  %v824_v26 = vsel %vm441_vm0, %v364_v61, 0.0  ;;  %v873_v13 = vsel %vm441_vm0, %v386_v25, 0.0  ;;  %v368_v35 = vld [vmem:[%s1499_s28 + $0x5b8] sm:$0xff] }
  0x6e   : > { %v762_v9 = vadd.f32 %v761_v45, %v760_v38  ;;  %v823_v53 = vadd.f32 %v822_v58, %v821_v18  ;;  %v826_v34 = vsel %vm441_vm0, %v365_v6, 0.0  ;;  %v872_v39 = vadd.f32 %v871_v8, %v870_v21  ;;  %v390_v6 = vld [vmem:[%s1499_s28 + $0x668] sm:$0xff]  ;;  %v369_v21 = vld [vmem:[%s1499_s28 + $0x5c0] sm:$0xff] }
  0x6f   : > { %v875_v40 = vsel %vm441_vm0, %v387_v30, 0.0  ;;  %v925_v31 = vsel %vm441_vm0, %v409_v10, 0.0  ;;  %v926_v27 = vsel %vm441_vm0, %v410_v1, 0.0  ;;  %v928_v41 = vsel %vm441_vm0, %v411_v51, 0.0  ;;  %v414_v30 = vld [vmem:[%s1499_s28 + $0x728] sm:$0xff] }
  0x70   : > { %v765_v48 = vsel %vm441_vm0, %v337_v19, 0.0  ;;  %v825_v59 = vadd.f32 %v824_v26, %v823_v53  ;;  %v874_v63 = vadd.f32 %v873_v13, %v872_v39  ;;  %v927_v52 = vadd.f32 %v926_v27, %v925_v31  ;;  %v391_v19 = vld [vmem:[%s1499_s28 + $0x670] sm:$0xff]  ;;  %v392_v53 = vld [vmem:[%s1499_s28 + $0x678] sm:$0xff] }
  0x71   : > { %v630_v61 = vadd.f32 %v1850_v42, %v628_v14  ;;  %v828_v25 = vsel %vm441_vm0, %v366_v0, 0.0  ;;  %v877_v38 = vsel %vm441_vm0, %v388_v37, 0.0  ;;  %v930_v62 = vsel %vm441_vm0, %v412_v36, 0.0  ;;  %v415_v14 = vld [vmem:[%s1499_s28 + $0x730] sm:$0xff] }
  0x72   : > { %v764_v45 = vadd.f32 %v763_v15, %v762_v9  ;;  %v827_v58 = vadd.f32 %v826_v34, %v825_v59  ;;  %v876_v8 = vadd.f32 %v875_v40, %v874_v63  ;;  %v929_v10 = vadd.f32 %v928_v41, %v927_v52  ;;  %v339_v9 = vld [vmem:[%s1499_s28 + $0x4d0] sm:$0xff]  ;;  %v416_v34 = vld [vmem:[%s1499_s28 + $0x738] sm:$0xff]  ;;  %v393_v59 = vld [vmem:[%s1499_s28 + $0x680] sm:$0xff] }
  0x73   : > { %v697_v1 = vadd.f32 %v1910_v54, %v695_v23  ;;  %v830_v42 = vsel %vm441_vm0, %v367_v44, 0.0  ;;  %v879_v51 = vsel %vm441_vm0, %v389_v56, 0.0  ;;  %v932_v18 = vsel %vm441_vm0, %v413_v20, 0.0  ;;  %v370_v20 = vld [vmem:[%s1499_s28 + $0x5c8] sm:$0xff]  ;;  %v417_v63 = vld [vmem:[%s1499_s28 + $0x740] sm:$0xff] }
  0x74   : > { %v767_v26 = vsel %vm441_vm0, %v338_v33, 0.0  ;;  %v829_v15 = vadd.f32 %v828_v25, %v827_v58  ;;  %v878_v13 = vadd.f32 %v877_v38, %v876_v8  ;;  %v931_v0 = vadd.f32 %v930_v62, %v929_v10 }
  0x75   : > { %v632_v37 = vadd.f32 %v1853_v43, %v630_v61  ;;  %v832_v54 = vsel %vm441_vm0, %v368_v35, 0.0  ;;  %v881_v23 = vsel %vm441_vm0, %v390_v6, 0.0  ;;  %v934_v36 = vsel %vm441_vm0, %v414_v30, 0.0  ;;  %v340_v35 = vld [vmem:[%s1499_s28 + $0x4d8] sm:$0xff]  ;;  %v394_v6 = vld [vmem:[%s1499_s28 + $0x688] sm:$0xff] }
  0x76   : > { %v766_v39 = vadd.f32 %v765_v48, %v764_v45  ;;  %v831_v40 = vadd.f32 %v830_v42, %v829_v15  ;;  %v880_v31 = vadd.f32 %v879_v51, %v878_v13  ;;  %v933_v27 = vadd.f32 %v932_v18, %v931_v0  ;;  %v418_v30 = vld [vmem:[%s1499_s28 + $0x748] sm:$0xff]  ;;  %v371_v42 = vld [vmem:[%s1499_s28 + $0x5d0] sm:$0xff] }
  0x77   : > { %v699_v41 = vadd.f32 %v1915_v2, %v697_v1  ;;  %v834_v43 = vsel %vm441_vm0, %v369_v21, 0.0  ;;  %v883_v44 = vsel %vm441_vm0, %v391_v19, 0.0  ;;  %v936_v56 = vsel %vm441_vm0, %v415_v14, 0.0  ;;  %v395_v51 = vld [vmem:[%s1499_s28 + $0x690] sm:$0xff] }
  0x78   : > { %v567_v48 = vadd.f32 %v1767_v49, %v1998_v12  ;;  %v833_v52 = vadd.f32 %v832_v54, %v831_v40  ;;  %v882_v33 = vadd.f32 %v881_v23, %v880_v31  ;;  %v935_v61 = vadd.f32 %v934_v36, %v933_v27  ;;  %v419_v18 = vld [vmem:[%s1499_s28 + $0x750] sm:$0xff]  ;;  %v396_v54 = vld [vmem:[%s1499_s28 + $0x698] sm:$0xff]  ;;  %v397_v40 = vld [vmem:[%s1499_s28 + $0x6a0] sm:$0xff] }
  0x79   : > { %v634_v2 = vadd.f32 %v1858_v47, %v632_v37  ;;  %v769_v25 = vsel %vm441_vm0, %v339_v9, 0.0  ;;  %v885_v38 = vsel %vm441_vm0, %v392_v53, 0.0  ;;  %v938_v62 = vsel %vm441_vm0, %v416_v34, 0.0  ;;  %v420_v23 = vld [vmem:[%s1499_s28 + $0x758] sm:$0xff]  ;;  %v421_v31 = vld [vmem:[%s1499_s28 + $0x760] sm:$0xff] }
  0x7a   : > { %v768_v45 = vadd.f32 %v767_v26, %v766_v39  ;;  %v835_v49 = vadd.f32 %v834_v43, %v833_v52  ;;  %v884_v12 = vadd.f32 %v883_v44, %v882_v33  ;;  %v937_v58 = vadd.f32 %v936_v56, %v935_v61  ;;  %v372_v39 = vld [vmem:[%s1499_s28 + $0x5d8] sm:$0xff]  ;;  %v373_v56 = vld [vmem:[%s1499_s28 + $0x5e0] sm:$0xff]  ;;  %v422_v33 = vld [vmem:[%s1499_s28 + $0x768] sm:$0xff] }
  0x7b   : > { %v701_v8 = vadd.f32 %v1932_v32, %v699_v41  ;;  %v836_v47 = vsel %vm441_vm0, %v370_v20, 0.0  ;;  %v887_v10 = vsel %vm441_vm0, %v393_v59, 0.0  ;;  %v940_v1 = vsel %vm441_vm0, %v417_v63, 0.0  ;;  %v341_v32 = vld [vmem:[%s1499_s28 + $0x4e0] sm:$0xff]  ;;  %v398_v20 = vld [vmem:[%s1499_s28 + $0x6a8] sm:$0xff]  ;;  %v399_v59 = vld [vmem:[%s1499_s28 + $0x6b0] sm:$0xff] }
  0x7c   : > { %v500_v21 = vadd.f32 %v1684_v22, %v1989_v16  ;;  %v569_v19 = vadd.f32 %v1770_v50, %v567_v48  ;;  %v886_v14 = vadd.f32 %v885_v38, %v884_v12  ;;  %v939_v26 = vadd.f32 %v938_v62, %v937_v58  ;;  %v1002_v38 = vld [vmem:[%s2268_s1] sm:$0xff] }
  0x7d   : > { %v636_v15 = vadd.f32 %v1868_v3, %v634_v2  ;;  %v771_v13 = vsel %vm441_vm0, %v340_v35, 0.0  ;;  %v889_v0 = vsel %vm441_vm0, %v394_v6, 0.0  ;;  %v942_v37 = vsel %vm441_vm0, %v418_v30, 0.0  ;;  %v423_v30 = vld [vmem:[%s1499_s28 + $0x770] sm:$0xff] }
  0x7e   : > { %v770_v22 = vadd.f32 %v769_v25, %v768_v45  ;;  %v837_v50 = vadd.f32 %v836_v47, %v835_v49  ;;  %v888_v16 = vadd.f32 %v887_v10, %v886_v14  ;;  %v941_v36 = vadd.f32 %v940_v1, %v939_v26  ;;  %v342_v47 = vld [vmem:[%s1499_s28 + $0x4e8] sm:$0xff] }
  0x7f   : > { %v703_v9 = vadd.f32 %v1941_v17, %v701_v8  ;;  %v838_v3 = vsel %vm441_vm0, %v371_v42, 0.0  ;;  %v891_v53 = vsel %vm441_vm0, %v395_v51, 0.0  ;;  %v944_v34 = vsel %vm441_vm0, %v419_v18, 0.0  ;;  %v1004_v8 = vld [vmem:[%s2268_s1 + $0x10] sm:$0xff]  ;;  %v400_v51 = vld [vmem:[%s1499_s28 + $0x6b8] sm:$0xff] }
  0x80   : > { %v502_v27 = vadd.f32 %v1691_v28, %v500_v21  ;;  %v773_v41 = vsel %vm441_vm0, %v341_v32, 0.0  ;;  %v890_v43 = vadd.f32 %v889_v0, %v888_v16  ;;  %v943_v44 = vadd.f32 %v942_v37, %v941_v36  ;;  %v424_v18 = vld [vmem:[%s1499_s28 + $0x778] sm:$0xff]  ;;  %v374_v0 = vld [vmem:[%s1499_s28 + $0x5e8] sm:$0xff]  ;;  %v401_v37 = vld [vmem:[%s1499_s28 + $0x6c0] sm:$0xff] }
  0x81   : > { %v571_v17 = vadd.f32 %v1777_v55, %v569_v19  ;;  %v638_v63 = vadd.f32 %v1871_v5, %v636_v15  ;;  %v893_v48 = vsel %vm441_vm0, %v396_v54, 0.0  ;;  %v946_v52 = vsel %vm441_vm0, %v420_v23, 0.0  ;;  %v1003_v55 = vld [vmem:[%s2268_s1 + $0x8] sm:$0xff]  ;;  %v425_v54 = vld [vmem:[%s1499_s28 + $0x780] sm:$0xff] }
  0x82   : > { %v772_v61 = vadd.f32 %v771_v13, %v770_v22  ;;  %v839_v2 = vadd.f32 %v838_v3, %v837_v50  ;;  %v892_v28 = vadd.f32 %v891_v53, %v890_v43  ;;  %v945_v25 = vadd.f32 %v944_v34, %v943_v44 }
  0x83   : > { %v705_v5 = vadd.f32 %v1953_v7, %v703_v9  ;;  %v840_v62 = vsel %vm441_vm0, %v372_v39, 0.0  ;;  %v895_v35 = vsel %vm441_vm0, %v397_v40, 0.0  ;;  %v948_v6 = vsel %vm441_vm0, %v421_v31, 0.0  ;;  %v1005_v7 = vld [vmem:[%s2268_s1 + $0x18] sm:$0xff]  ;;  %v343_v9 = vld [vmem:[%s1499_s28 + $0x4f0] sm:$0xff]  ;;  %v402_v39 = vld [vmem:[%s1499_s28 + $0x6c8] sm:$0xff] }
  0x84   : > { %v842_v45 = vsel %vm441_vm0, %v373_v56, 0.0  ;;  %v894_v49 = vadd.f32 %v893_v48, %v892_v28  ;;  %v897_v12 = vsel %vm441_vm0, %v398_v20, 0.0  ;;  %v947_v58 = vadd.f32 %v946_v52, %v945_v25  ;;  %v426_v40 = vld [vmem:[%s1499_s28 + $0x788] sm:$0xff] }
  0x85   : > { %v899_v10 = vsel %vm441_vm0, %v399_v59, 0.0  ;;  %v950_v1 = vsel %vm441_vm0, %v422_v33, 0.0  ;;  %v1274_v42 = vpack.c.bf16 %v1003_v55, %v1002_v38  ;;  %v774_v21 = vadd.f32 %v773_v41, %v772_v61  ;;  %v403_v59 = vld [vmem:[%s1499_s28 + $0x6d0] sm:$0xff]  ;;  %v344_v33 = vld [vmem:[%s1499_s28 + $0x4f8] sm:$0xff] }
  0x86   : > { %v841_v19 = vadd.f32 %v840_v62, %v839_v2  ;;  %v896_v14 = vadd.f32 %v895_v35, %v894_v49  ;;  %v949_v26 = vadd.f32 %v948_v6, %v947_v58  ;;  %v1422_v32 = vmov 0.0|0.0   ;;  %v404_v38 = vld [vmem:[%s1499_s28 + $0x6d8] sm:$0xff]  ;;  %v429_v58 = vld [vmem:[%s1499_s28 + $0x7a0] sm:$0xff] }
  0x87   : > { %1273 = vmatprep.subr.bf16.mxu0 %v1422_v32  ;;  %v952_v15 = vsel %vm441_vm0, %v423_v30, 0.0  ;;  %v1277_v13 = vpack.c.bf16 %v1005_v7, %v1004_v8  ;;  %v707_v23 = vadd.f32 %v1962_v24, %v705_v5  ;;  %v775_v22 = vsel %vm441_vm0, %v342_v47, 0.0  ;;  %v428_v55 = vld [vmem:[%s1499_s28 + $0x798] sm:$0xff] }
  0x88   : > { %1275 = vmatpush3.bf16.msra.mxu0 %v1274_v42  ;;  %v898_v50 = vadd.f32 %v897_v12, %v896_v14  ;;  %v951_v16 = vadd.f32 %v950_v1, %v949_v26  ;;  %v1424_v36 = vmov 0.0   ;;  %v504_v3 = vadd.f32 %v1694_v29, %v502_v27  ;;  %v375_v27 = vld [vmem:[%s1499_s28 + $0x5f0] sm:$0xff]  ;;  %v405_v12 = vld [vmem:[%s1499_s28 + $0x6e0] sm:$0xff] }
  0x89   : > { %1276 = vmatprep.subr.bf16.mxu0 %v1422_v32  ;;  %1270 = vmatprep.mubr.msk.f32.mxu0 %vm1423_vm1, %v1424_v36  ;;  %v640_v53 = vadd.f32 %v1880_v11, %v638_v63  ;;  %v901_v34 = vsel %vm441_vm0, %v400_v51, 0.0  ;;  %v954_v24 = vsel %vm441_vm0, %v424_v18, 0.0  ;;  %v573_v31 = vadd.f32 %v1780_v60, %v571_v17  ;;  %v427_v63 = vld [vmem:[%s1499_s28 + $0x790] sm:$0xff] }
  0x8a   : > { %v843_v41 = vadd.f32 %v842_v45, %v841_v19  ;;  %v900_v43 = vadd.f32 %v899_v10, %v898_v50  ;;  %v953_v44 = vadd.f32 %v952_v15, %v951_v16  ;;  %v776_v56 = vadd.f32 %v775_v22, %v774_v21  ;;  %v406_v21 = vld [vmem:[%s1499_s28 + $0x6e8] sm:$0xff] }
  0x8b   : > { %v844_v20 = vsel %vm441_vm0, %v374_v0, 0.0  ;;  %v903_v29 = vsel %vm441_vm0, %v401_v37, 0.0  ;;  %v956_v11 = vsel %vm441_vm0, %v425_v54, 0.0  ;;  %v709_v48 = vadd.f32 %v1974_v46, %v707_v23  ;;  %v430_v19 = vld [vmem:[%s1499_s28 + $0x7a8] sm:$0xff]  ;;  %v407_v54 = vld [vmem:[%s1499_s28 + $0x6f0] sm:$0xff] }
  0x8c   : > { %1278 = vmatpush3.bf16.msra.mxu0 %v1277_v13  ;;  %v777_v60 = vsel %vm441_vm0, %v343_v9, 0.0  ;;  %v902_v17 = vadd.f32 %v901_v34, %v900_v43  ;;  %v955_v52 = vadd.f32 %v954_v24, %v953_v44  ;;  %v505_v61 = vrot.slane %v504_v3, 4  ;;  %v431_v23 = vld [vmem:[%s1499_s28 + $0x7b0] sm:$0xff]  ;;  %v408_v34 = vld [vmem:[%s1499_s28 + $0x6f8] sm:$0xff] }
  0x8d   : > { %v642_v2 = vadd.f32 %v1883_v57, %v640_v53  ;;  %v905_v28 = vsel %vm441_vm0, %v402_v39, 0.0  ;;  %v958_v25 = vsel %vm441_vm0, %v426_v40, 0.0  ;;  %v574_v5 = vrot.slane %v573_v31, 4  ;;  %v376_v57 = vld [vmem:[%s1499_s28 + $0x5f8] sm:$0xff] }
  0x8e   : > { %v845_v62 = vadd.f32 %v844_v20, %v843_v41  ;;  %v904_v46 = vadd.f32 %v903_v29, %v902_v17  ;;  %v957_v35 = vadd.f32 %v956_v11, %v955_v52  ;;  %v778_v6 = vadd.f32 %v777_v60, %v776_v56  ;;  %v432_v24 = vld [vmem:[%s1499_s28 + $0x7b8] sm:$0xff]  ;;  %v433_v20 = vld [vmem:[%s1499_s28 + $0x7c0] sm:$0xff]  ;;  %v434_v17 = vld [vmem:[%s1499_s28 + $0x7c8] sm:$0xff] }
  0x8f   : > { %v846_v30 = vsel %vm441_vm0, %v375_v27, 0.0  ;;  %v907_v45 = vsel %vm441_vm0, %v403_v59, 0.0  ;;  %v960_v49 = vsel %vm441_vm0, %v427_v63, 0.0  ;;  %v711_v8 = vadd.f32 %v1984_v4, %v709_v48 }
  0x90   : > { %v779_v7 = vsel %vm441_vm0, %v344_v33, 0.0  ;;  %v906_v47 = vadd.f32 %v905_v28, %v904_v46  ;;  %v959_v10 = vadd.f32 %v958_v25, %v957_v35  ;;  %v506_v1 = vadd.f32 %v505_v61, %v504_v3 }
  0x91   : > { %v643_v42 = vrot.slane %v642_v2, 4  ;;  %v909_v51 = vsel %vm441_vm0, %v404_v38, 0.0  ;;  %v962_v18 = vsel %vm441_vm0, %v428_v55, 0.0  ;;  %v575_v14 = vadd.f32 %v574_v5, %v573_v31  ;;  %v435_v38 = vld [vmem:[%s1499_s28 + $0x7d0] sm:$0xff] }
  0x92   : > { %v847_v26 = vadd.f32 %v846_v30, %v845_v62  ;;  %v908_v32 = vadd.f32 %v907_v45, %v906_v47  ;;  %v961_v4 = vadd.f32 %v960_v49, %v959_v10  ;;  %v780_v15 = vadd.f32 %v779_v7, %v778_v6  ;;  %v436_v30 = vld [vmem:[%s1499_s28 + $0x7d8] sm:$0xff]  ;;  %v437_v7 = vld [vmem:[%s1499_s28 + $0x7e0] sm:$0xff] }
  0x93   : > { %v848_v13 = vsel %vm441_vm0, %v376_v57, 0.0  ;;  %v911_v0 = vsel %vm441_vm0, %v405_v12, 0.0  ;;  %v964_v37 = vsel %vm441_vm0, %v429_v58, 0.0  ;;  %v712_v22 = vrot.slane %v711_v8, 4 }
  0x94   : > { %v910_v50 = vadd.f32 %v909_v51, %v908_v32  ;;  %v963_v16 = vadd.f32 %v962_v18, %v961_v4  ;;  %v507_v36 = vrot.slane %v506_v1, 2  ;;  %v644_v9 = vadd.f32 %v643_v42, %v642_v2  ;;  %v438_v18 = vld [vmem:[%s1499_s28 + $0x7e8] sm:$0xff] }
  0x95   : > { %v913_v3 = vsel %vm441_vm0, %v406_v21, 0.0  ;;  %v966_v53 = vsel %vm441_vm0, %v430_v19, 0.0  ;;  %v576_v39 = vrot.slane %v575_v14, 2  ;;  %v849_v40 = vadd.f32 %v848_v13, %v847_v26 }
  0x96   : > { %v912_v31 = vadd.f32 %v911_v0, %v910_v50  ;;  %v965_v41 = vadd.f32 %v964_v37, %v963_v16  ;;  %v781_v43 = vrot.slane %v780_v15, 4  ;;  %v915_v44 = vsel %vm441_vm0, %v407_v54, 0.0 }
  0x97   : > { %v968_v56 = vsel %vm441_vm0, %v431_v23, 0.0  ;;  %v713_v29 = vadd.f32 %v712_v22, %v711_v8  ;;  %v508_v59 = vadd.f32 %v507_v36, %v506_v1  ;;  %v645_v63 = vrot.slane %v644_v9, 2  ;;  %v440_v22 = vld [vmem:[%s1499_s28 + $0x7f8] sm:$0xff] }
  0x98   : > { %v914_v11 = vadd.f32 %v913_v3, %v912_v31  ;;  %v967_v27 = vadd.f32 %v966_v53, %v965_v41  ;;  %v917_v48 = vsel %vm441_vm0, %v408_v34, 0.0  ;;  %v970_v60 = vsel %vm441_vm0, %v432_v24, 0.0 }
  0x99   : > { %v577_v52 = vadd.f32 %v576_v39, %v575_v14  ;;  %v850_v33 = vrot.slane %v849_v40, 4  ;;  %v782_v28 = vadd.f32 %v781_v43, %v780_v15  ;;  %v972_v25 = vsel %vm441_vm0, %v433_v20, 0.0  ;;  %v439_v15 = vld [vmem:[%s1499_s28 + $0x7f0] sm:$0xff]  ;;  %s1326_s28 = scalar_lea.vmem %s2195_s20, 128 }
  0x9a   : > { %v916_v61 = vadd.f32 %v915_v44, %v914_v11  ;;  %v969_v2 = vadd.f32 %v968_v56, %v967_v27  ;;  %v714_v55 = vrot.slane %v713_v29, 2  ;;  %v509_v46 = vrot.slane %v508_v59, 1  ;;  %p1327_p11 = scmp.ne.s32.totalorder %s2195_s20, %s1326_s28  ;;  %p1334_p1 = scmp.lt.s32.totalorder %s1332_s4, %s1326_s28 }
  0x9b   : > { %v646_v35 = vadd.f32 %v645_v63, %v644_v9  ;;  %v974_v6 = vsel %vm441_vm0, %v434_v17, 0.0  ;;  %v578_v45 = vrot.slane %v577_v52, 1  ;;  %v851_v49 = vadd.f32 %v850_v33, %v849_v40 }
  0x9c   : > { %v918_v5 = vadd.f32 %v917_v48, %v916_v61  ;;  %v971_v62 = vadd.f32 %v970_v60, %v969_v2  ;;  %v783_v58 = vrot.slane %v782_v28, 2  ;;  %v976_v8 = vsel %vm441_vm0, %v435_v38, 0.0  ;;  %p1328_p12 = pnand %p1327_p11, %p1485_p5  ;;  %p1335_p2 = por %p1334_p1, %p1333_p0 }
  0x9d   : > { %v715_v47 = vadd.f32 %v714_v55, %v713_v29  ;;  %v647_v1 = vrot.slane %v646_v35, 1  ;;  %v978_v51 = vsel %vm441_vm0, %v436_v30, 0.0  ;;  %v510_v21 = vadd.f32 %v509_v46, %v508_v59 }
  0x9e   : > { %v919_v57 = vrot.slane %v918_v5, 4  ;;  %v973_v12 = vadd.f32 %v972_v25, %v971_v62  ;;  %v579_v19 = vadd.f32 %v578_v45, %v577_v52  ;;  %v852_v14 = vrot.slane %v851_v49, 2  ;;  %p1329_p13 = pneg %p1328_p12 }
  0x9f   : > { %v784_v32 = vadd.f32 %v783_v58, %v782_v28  ;;  %v980_v4 = vsel %vm441_vm0, %v437_v7, 0.0  ;;  %v716_v13 = vrot.slane %v715_v47, 1  ;;  %v648_v37 = vadd.f32 %v647_v1, %v646_v35 }
  0xa0   : > { %v975_v10 = vadd.f32 %v974_v6, %v973_v12  ;;  %v920_v42 = vadd.f32 %v919_v57, %v918_v5  ;;  %v982_v23 = vsel %vm441_vm0, %v438_v18, 0.0  ;;  %v853_v50 = vadd.f32 %v852_v14, %v851_v49  ;;  %p1336_p3 = pnand %p1335_p2, %p1329_p13 }
  0xa1   : > { %v994_v36 = vmul.f32 0.00390625, %v510_v21  ;;  %v995_v9 = vmul.f32 0.00390625, %v579_v19  ;;  %v785_v3 = vrot.slane %v784_v32, 1  ;;  %v984_v53 = vsel %vm441_vm0, %v439_v15, 0.0 }
  0xa2   : > { %v977_v26 = vadd.f32 %v976_v8, %v975_v10  ;;  %v921_v54 = vrot.slane %v920_v42, 2  ;;  %v717_v34 = vadd.f32 %v716_v13, %v715_v47  ;;  %v986_v40 = vsel %vm441_vm0, %v440_v22, 0.0 }
  0xa3   : > { %v996_v31 = vmul.f32 0.00390625, %v648_v37  ;;  %v854_v41 = vrot.slane %v853_v50, 1  ;;  %v1015_v44 = vsel %vm1014_vm2, %v995_v9, %v994_v36  ;;  %v786_v56 = vadd.f32 %v785_v3, %v784_v32 }
  0xa4   : > { %v979_v0 = vadd.f32 %v978_v51, %v977_v26  ;;  %v922_v39 = vadd.f32 %v921_v54, %v920_v42  ;;  %v997_v29 = vmul.f32 0.00390625, %v717_v34 }
  0xa5   : > { %v1017_v27 = vsel %vm1016_vm3, %v996_v31, %v1015_v44  ;;  %v855_v59 = vadd.f32 %v854_v41, %v853_v50  ;;  %v998_v48 = vmul.f32 0.00390625, %v786_v56 }
  0xa6   : > { %v981_v16 = vadd.f32 %v980_v4, %v979_v0  ;;  %v923_v11 = vrot.slane %v922_v39, 1  ;;  %v1019_v17 = vsel %vm1018_vm4, %v997_v29, %v1017_v27 }
  0xa7   : > { %v999_v61 = vmul.f32 0.00390625, %v855_v59  ;;  %v1021_v2 = vsel %vm1020_vm5, %v998_v48, %v1019_v17 }
  0xa8   : > { %v983_v24 = vadd.f32 %v982_v23, %v981_v16  ;;  %v924_v52 = vadd.f32 %v923_v11, %v922_v39 }
  0xa9   : > { %v1023_v55 = vsel %vm1022_vm6, %v999_v61, %v1021_v2 }
  0xaa   : > { %v985_v43 = vadd.f32 %v984_v53, %v983_v24  ;;  %v1000_v25 = vmul.f32 0.00390625, %v924_v52 }
  0xac   : > { %v987_v20 = vadd.f32 %v986_v40, %v985_v43  ;;  %v1025_v62 = vsel %vm1024_vm7, %v1000_v25, %v1023_v55 }
  0xae   : > { %v988_v63 = vrot.slane %v987_v20, 4 }
  0xb0   : > { %v989_v60 = vadd.f32 %v988_v63, %v987_v20 }
  0xb2   : > { %v990_v33 = vrot.slane %v989_v60, 2 }
  0xb4   : > { %v991_v28 = vadd.f32 %v990_v33, %v989_v60 }
  0xb6   : > { %v992_v38 = vrot.slane %v991_v28, 1 }
  0xb8   : > { %v993_v5 = vadd.f32 %v992_v38, %v991_v28 }
  0xba   : > { %v1001_v46 = vmul.f32 0.00390625, %v993_v5 }
  0xbc   : > { %v1027_v35 = vsel %vm1026_vm8, %v1001_v46, %v1025_v62 }
  0xbd   : > { %1271 = vmatmul.mubr.msk.f32.vlgmr.msra.gmra.mrb[0].mxu0 %vm441_vm0, %v1027_v35 }
 0x190   : > { %v1096_v6 = vpop.f32.mrb[0].mxu0 }
 0x191   : > { %1100 = vst [vmem:[%s170_s19] sm:$0xff] %v1096_v6  ;;  %v1272_v30 = vpop.f32.mrb[1].mxu0  ;;  %v1101_v45 = vrot.slane %v1096_v6, 4  ;;  %v1107_v49 = vmul.f32 %v1096_v6, %v1096_v6 }
 0x192   : > { %1339 = shalt.err (!%p1336_p3)
}
 0x193   : > { %s1340_s5 = scalar_lea.hbm %s2193_s26, 128  ;;  %s1344_s8 = scalar_lea.hbm %s2269_s2, 256 }
 0x194   : > { %p1341_p4 = scmp.ne.s32.totalorder %s2193_s26, %s1340_s5  ;;  %p1345_p9 = scmp.lt.u32.totalorder %s2193_s26, %s2269_s2 }
 0x195   : > { %p1346_p10 = scmp.lt.u32.totalorder %s1344_s8, %s1340_s5  ;;  %p1348_p12 = scmp.lt.u32.totalorder %s1340_s5, %s2193_s26 }
 0x196   : > { %p1342_p7 = pnand %p1341_p4, %p1485_p5 }
 0x197   : > { %p1347_p11 = por %p1346_p10, %p1345_p9 }
 0x198   : > { %p1343_p8 = pneg %p1342_p7 }
 0x199   : > { %p1349_p13 = por %p1348_p12, %p1347_p11 }
 0x19b   : > { %p1350_p0 = pnand %p1349_p13, %p1343_p8 }
 0x19d   : > { %1353 = shalt.err (!%p1350_p0)
}
 0x19e   : > { %1279 = dma.vmem_to_hbm [thread:$0]  (%p1485_p5), %s2195_s20, 128, %s2193_s26, %s1118_s27   ;;  %v1102_v57 = vadd.f32 %v1101_v45, %v1096_v6  ;;  %v1108_v12 = vrot.slane %v1107_v49, 4  ;;  %vm1114_vm9 = vcmask 1040384  }
 0x19f   : > { %s1245_s17 = sshll.u32 %s2186_s10, 1  ;;  %s1253_s19 = sshll.u32 %s1468_s16, 5 }
 0x1a0   : > { %v1103_v58 = vrot.slane %v1102_v57, 2  ;;  %v1109_v8 = vadd.f32 %v1108_v12, %v1107_v49  ;;  %s177_s24 = scalar_lea.vmem [#allocation4], %s1245_s17  ;;  %s2224_s26 = scalar_lea.hbm %s2270_s3, %s1253_s19 }
 0x1a1   : > { %s1149_s25 = sshll.u32 %s177_s24, 4  ;;  %s1123_s27 = scalar_lea.sflag [#allocation5], %s2186_s10  ;;  %s2226_s25 = int_to_ptr.vmem [resolvable:$true] %s1149_s25 }
 0x1a2   : > { %v1104_v7 = vadd.f32 %v1103_v58, %v1102_v57  ;;  %v1110_v47 = vrot.slane %v1109_v8, 2  ;;  %s1354_s29 = scalar_lea.vmem %s2226_s25, 32  ;;  %s1426_s16 = smov [#allocation4]  }
 0x1a3   : > { %p1355_p1 = scmp.ne.s32.totalorder %s2226_s25, %s1354_s29  ;;  %s1358_s30 = sshll.u32 %s1426_s16, 4  ;;  %s1359_s30 = int_to_ptr.vmem [resolvable:$false] %s1358_s30 }
 0x1a4   : > { %v1105_v10 = vrot.slane %v1104_v7, 1  ;;  %v1111_v1 = vadd.f32 %v1110_v47, %v1109_v8  ;;  %s1360_s4 = scalar_lea.vmem %s1359_s30, 64  ;;  %p1361_p4 = scmp.lt.s32.totalorder %s2226_s25, %s1359_s30 }
 0x1a5   : > { %p1356_p2 = pnand %p1355_p1, %p1485_p5  ;;  %p1362_p7 = scmp.lt.s32.totalorder %s1360_s4, %s1354_s29 }
 0x1a6   : > { %v1112_v42 = vrot.slane %v1111_v1, 1  ;;  %v1106_v51 = vadd.f32 %v1105_v10, %v1104_v7 }
 0x1a7   : > { %p1357_p3 = pneg %p1356_p2  ;;  %p1363_p8 = por %p1362_p7, %p1361_p4 }
 0x1a8   : > { %v1113_v18 = vadd.f32 %v1112_v42, %v1111_v1 }
 0x1a9   : > { %p1364_p9 = pnand %p1363_p8, %p1357_p3 }
 0x1aa   : > { %v1115_v21 = vsel %vm1114_vm9, %v1106_v51, %v1113_v18 }
 0x1ab   : > { %1116 = vst [vmem:[%s177_s24] sm:$0x3] %v1115_v21 }
 0x1ac   : > { %1367 = shalt.err (!%p1364_p9)
}
 0x1ad   : > { %s1368_s10 = scalar_lea.hbm %s2224_s26, 32  ;;  %s1372_s7 = scalar_lea.hbm %s2270_s3, 64 }
 0x1ae   : > { %p1369_p10 = scmp.ne.s32.totalorder %s2224_s26, %s1368_s10  ;;  %p1373_p13 = scmp.lt.u32.totalorder %s2224_s26, %s2270_s3 }
 0x1af   : > { %p1374_p0 = scmp.lt.u32.totalorder %s1372_s7, %s1368_s10  ;;  %p1376_p2 = scmp.lt.u32.totalorder %s1368_s10, %s2224_s26 }
 0x1b0   : > { %p1370_p11 = pnand %p1369_p10, %p1485_p5 }
 0x1b1   : > { %p1375_p1 = por %p1374_p0, %p1373_p13 }
 0x1b2   : > { %p1371_p12 = pneg %p1370_p11 }
 0x1b3   : > { %p1377_p3 = por %p1376_p2, %p1375_p1 }
 0x1b5   : > { %p1378_p4 = pnand %p1377_p3, %p1371_p12 }
 0x1b7   : > { %1381 = shalt.err (!%p1378_p4)
}
 0x1b8   : > { %1280 = dma.vmem_to_hbm [thread:$0]  (%p1485_p5), %s2226_s25, 32, %s2224_s26, %s1123_s27  }
 0x1b9 PF: > { %p1290_p7 = scmp.ge.s32.totalorder %s1420_s15, 2  ;;  %s1161_s11 = sand.u32 1, %s1408_s12  }
 0x1ba   : > { %s1162_s17 = scalar_lea.sflag [#allocation3], %s1161_s11 }
 0x1bb   : > { %p1284_p8 = pnand %p1290_p7, %p1489_p6 }
 0x1bd   : > { %1399 = dma.done.wait (!%p1284_p8), %s1162_s17, 128  }
 0x1be   : > { %1401 = vsyncadd (!%p1284_p8), %s1162_s17, 4294967168  ;;  %s1171_s19 = scalar_lea.sflag [#allocation5], %s1161_s11 }
 0x1bf   : > { %1403 = dma.done.wait (!%p1284_p8), %s1171_s19, 32  }
 0x1c0   : > { %1405 = vsyncadd (!%p1284_p8), %s1171_s19, 4294967264  ;;  %p17_p5 = scmp.ge.s32.totalorder %s1472_s18, 4   ;;  %s2273_s12 = smov %s1412_s13 }
 0x1c1   : > { %s2274_s13 = smov %s1416_s14  ;;  %s2275_s14 = smov %s1483_s21 }
 0x1c2   : > { %s2276_s15 = smov %s1472_s18  ;;  %19 = sbr.rel (!%p17_p5) target bundleno = 5 (0x5), region = 80 }
 0x1c9   :  { %1176 = vsyncpa [#allocation3], 1 }
 0x1ca   :  { %1178 = vsyncpa [#allocation3 + $0x1], 1 }
 0x1cb   :  { %1179 = vsyncpa [#allocation5], 1 }
 0x1cc   :  { %1181 = vsyncpa [#allocation5 + $0x1], 1 }

</bundles_post_ra>
